<compile_context>
chip_gen: v6e
topology: v6e:2x2x1
jax: 0.10.0
libtpu: 0.0.40
codegen_flags: <defaults>
</compile_context>

<pallas_src>
import functools

import jax
import jax.numpy as jnp
from jax import lax
from jax.experimental import pallas as pl
from jax.experimental.pallas import tpu as pltpu

EPS = 1e-5


# ------------------ shared body: sub-pixel convT (one MXU matmul) + ReLU ------------------
def _subpixel_conv_relu(xp_ref, w_ref, *, H, W, Cin):
    """xp_ref: (1, H+1, W+1, Cin) zero-padded input block; w_ref: (4*Cin, 4*Cout).

    Returns the (H*W, 4*Cout) f32 activation, columns ordered (py, px, co).
    """
    shifts = []
    for dy in range(2):
        for dx in range(2):
            shifts.append(xp_ref[0, pl.ds(dy, H), pl.ds(dx, W), :])     # (H, W, Cin)
    patches = jnp.concatenate(shifts, axis=-1)                          # (H, W, 4*Cin)
    patches = patches.reshape(H * W, 4 * Cin)
    res = jnp.dot(patches, w_ref[...], preferred_element_type=jnp.float32)
    return jnp.maximum(res, 0.0)                                        # ReLU


# ----------------- Kernel 1: per-batch-element partial batch statistics -----------------
def _stats_kernel(xp_ref, w_ref, s1_ref, s2_ref, *, H, W, Cin, Cout):
    res = _subpixel_conv_relu(xp_ref, w_ref, H=H, W=W, Cin=Cin)         # (H*W, 4*Cout)
    s = jnp.sum(res, axis=0, keepdims=True)                             # (1, 4*Cout)
    s2 = jnp.sum(res * res, axis=0, keepdims=True)                      # (1, 4*Cout)
    s1_ref[0] = (s[:, 0:Cout] + s[:, Cout:2 * Cout]
                 + s[:, 2 * Cout:3 * Cout] + s[:, 3 * Cout:4 * Cout])
    s2_ref[0] = (s2[:, 0:Cout] + s2[:, Cout:2 * Cout]
                 + s2[:, 2 * Cout:3 * Cout] + s2[:, 3 * Cout:4 * Cout])


# --------------- Kernel 2: recompute conv+ReLU, apply BN affine, write once ---------------
def _conv_bn_kernel(xp_ref, w_ref, scale_ref, shift_ref, o_ref, *, H, W, Cin):
    res = _subpixel_conv_relu(xp_ref, w_ref, H=H, W=W, Cin=Cin)         # (H*W, 4*Cout)
    # scale/shift are (1, 4*Cout) with col % Cout == channel -> broadcast over rows.
    o_ref[0] = (res * scale_ref[...] + shift_ref[...]).astype(o_ref.dtype)


# ----------------------------------------- Wrapper -----------------------------------------
@functools.partial(jax.jit, static_argnames=("stride", "p", "op"))
def revS_forward(x_nchw, w_t, gamma, beta, *, stride=2, p=1, op=1):
    """x_nchw: (N, Cin, H, W) f32; w_t: ConvTranspose2d weight (Cin, Cout, 3, 3)."""
    N, Cin, H, W = x_nchw.shape
    Cout = w_t.shape[1]
    assert (stride, p, op) == (2, 1, 1), "kernel specialized to the module defaults"
    Hout, Wout = 2 * H, 2 * W

    # ---- glue: NCHW -> NHWC; pad one zero row/col on bottom/right for the +1 shifts ----
    x = jnp.transpose(x_nchw, (0, 2, 3, 1))                    # (N, H, W, Cin)
    xpad = jnp.pad(x, ((0, 0), (0, 1), (0, 1), (0, 0)))        # (N, H+1, W+1, Cin)

    # ---- fused sub-pixel weight: rows = shift (dy,dx)*Cin, cols = phase (py,px)*Cout ----
    # Tap mapping (from out[oy,ox] = sum x[(oy+1-ky)/2,(ox+1-kx)/2] * w[ky,kx]):
    #   ky = py + 1 - 2*dy, kx = px + 1 - 2*dx, valid iff (dy==0 or py==1) and (dx==0 or px==1).
    wb = jnp.zeros((4 * Cin, 4 * Cout), jnp.float32)
    for dy in range(2):
        for dx in range(2):
            for py in range(2):
                for px in range(2):
                    if (dy == 0 or py == 1) and (dx == 0 or px == 1):
                        ky, kx = py + 1 - 2 * dy, px + 1 - 2 * dx
                        si, pi = 2 * dy + dx, 2 * py + px
                        wb = wb.at[si * Cin:(si + 1) * Cin,
                                   pi * Cout:(pi + 1) * Cout].set(w_t[:, :, ky, kx])

    in_specs_common = [
        pl.BlockSpec((1, H + 1, W + 1, Cin), lambda n: (n, 0, 0, 0)),
        pl.BlockSpec((4 * Cin, 4 * Cout), lambda n: (0, 0)),
    ]

    # ---- Pass 1: conv+ReLU -> per-batch partial sums (no big intermediate to HBM) ----
    kern_stats = functools.partial(_stats_kernel, H=H, W=W, Cin=Cin, Cout=Cout)
    s1, s2 = pl.pallas_call(
        kern_stats,
        out_shape=(
            jax.ShapeDtypeStruct((N, 1, Cout), jnp.float32),
            jax.ShapeDtypeStruct((N, 1, Cout), jnp.float32),
        ),
        grid_spec=pltpu.PrefetchScalarGridSpec(
            num_scalar_prefetch=0,
            grid=(N,),
            in_specs=in_specs_common,
            out_specs=(
                pl.BlockSpec((1, 1, Cout), lambda n: (n, 0, 0)),
                pl.BlockSpec((1, 1, Cout), lambda n: (n, 0, 0)),
            ),
        ),
        compiler_params=pltpu.CompilerParams(dimension_semantics=("parallel",)),
    )(xpad, wb)

    # ---- per-channel batch statistics (tiny cross-batch reduction in XLA) ----
    count = jnp.float32(N * Hout * Wout)
    mean = jnp.sum(s1[:, 0, :], axis=0) / count
    var = jnp.sum(s2[:, 0, :], axis=0) / count - mean * mean   # biased (training-mode BN)
    scale = gamma * lax.rsqrt(var + EPS)
    shift = beta - mean * scale
    scale4 = jnp.tile(scale, 4).reshape(1, 4 * Cout)           # col % Cout == channel
    shift4 = jnp.tile(shift, 4).reshape(1, 4 * Cout)

    # ---- Pass 2: recompute conv+ReLU, fuse the BN affine, single HBM write ----
    kern_bn = functools.partial(_conv_bn_kernel, H=H, W=W, Cin=Cin)
    y = pl.pallas_call(
        kern_bn,
        out_shape=jax.ShapeDtypeStruct((N, H * W, 4 * Cout), jnp.float32),
        grid_spec=pltpu.PrefetchScalarGridSpec(
            num_scalar_prefetch=0,
            grid=(N,),
            in_specs=in_specs_common + [
                pl.BlockSpec((1, 4 * Cout), lambda n: (0, 0)),
                pl.BlockSpec((1, 4 * Cout), lambda n: (0, 0)),
            ],
            out_specs=pl.BlockSpec((1, H * W, 4 * Cout), lambda n: (n, 0, 0)),
        ),
        compiler_params=pltpu.CompilerParams(dimension_semantics=("parallel",)),
    )(xpad, wb, scale4, shift4)

    # ---- sub-pixel de-interleave + NHWC->NCHW as one fused XLA transpose ----
    # y layout: (n, m, w, py, px, co)  ->  out[n, co, 2m+py, 2w+px]
    o = y.reshape(N, H, W, 2, 2, Cout)
    o = jnp.transpose(o, (0, 5, 1, 3, 2, 4))
    # Dropout2d(p=0.0) == identity.
    return o.reshape(N, Cout, Hout, Wout)


# ---------------------------- Pure-JAX reference (for validation) ----------------------------
def _ref_forward(x_nchw, w_t, gamma, beta):
    x = jnp.transpose(x_nchw, (0, 2, 3, 1))                    # NHWC
    w4 = jnp.transpose(w_t[:, :, ::-1, ::-1], (2, 3, 0, 1))    # HWIO (flipped)
    y = lax.conv_general_dilated(
        x, w4, window_strides=(1, 1), padding=[(1, 2), (1, 2)],
        lhs_dilation=(2, 2),
        dimension_numbers=("NHWC", "HWIO", "NHWC"))
    y = jnp.maximum(y, 0.0)
    mean = jnp.mean(y, axis=(0, 1, 2))
    var = jnp.mean((y - mean) ** 2, axis=(0, 1, 2))
    o = (y - mean) * lax.rsqrt(var + EPS) * gamma + beta
    return jnp.transpose(o, (0, 3, 1, 2))


if __name__ == "__main__":
    key = jax.random.PRNGKey(0)
    k1, k2 = jax.random.split(key)

    N, Cin, H, W = 2, 4, 16, 16
    Cout = 8

    x = jax.random.normal(k1, (N, Cin, H, W), jnp.float32)
    # ConvTranspose2d weight shape: (in_channels, out_channels, kH, kW), bias=False.
    w_t = 0.1 * jax.random.normal(k2, (Cin, Cout, 3, 3), jnp.float32)
    gamma = jnp.ones((Cout,), jnp.float32)   # BatchNorm2d default init
    beta = jnp.zeros((Cout,), jnp.float32)

    out = jax.block_until_ready(revS_forward(x, w_t, gamma, beta))

    ref = _ref_forward(x, w_t, gamma, beta)
    assert out.shape == (N, Cout, 2 * H, 2 * W), out.shape
    err = float(jnp.max(jnp.abs(out - ref)))
    assert jnp.allclose(out, ref, atol=1e-4, rtol=1e-4), err

    print("KERNEL_OK")
</pallas_src>

<mosaic_0001>
module attributes {stable_mosaic.version = 11 : i64} {
  func.func @_stats_kernel(%arg0: i32, %arg1: memref<1x17x17x4xf32, #tpu.memory_space<vmem>>, %arg2: memref<16x32xf32, #tpu.memory_space<vmem>>, %arg3: memref<1x1x8xf32, #tpu.memory_space<vmem>>, %arg4: memref<1x1x8xf32, #tpu.memory_space<vmem>>) attributes {dimension_semantics = [#tpu.dimension_semantics<parallel>], iteration_bounds = array<i64: 2>, scalar_prefetch = 0 : i64, scratch_operands = 0 : i64, tpu.core_type = #tpu.core_type<tc>, window_params = [{transform_indices = @transform_0, window_bounds = array<i64: 1, 17, 17, 4>}, {pipeline_mode = #tpu.pipeline_mode<synchronous>, transform_indices = @transform_1, window_bounds = array<i64: 16, 32>}, {transform_indices = @transform_2, window_bounds = array<i64: 1, 1, 8>}, {transform_indices = @transform_3, window_bounds = array<i64: 1, 1, 8>}]} {
    %c0 = arith.constant 0 : index
    %c0_0 = arith.constant 0 : index
    %c0_1 = arith.constant 0 : index
    %c0_2 = arith.constant 0 : index
    %0 = vector.load %arg1[%c0, %c0_0, %c0_1, %c0_2] : memref<1x17x17x4xf32, #tpu.memory_space<vmem>>, vector<1x16x16x4xf32>
    %1 = vector.shape_cast %0 : vector<1x16x16x4xf32> to vector<16x16x4xf32>
    %c0_3 = arith.constant 0 : index
    %c0_4 = arith.constant 0 : index
    %c1 = arith.constant 1 : index
    %c0_5 = arith.constant 0 : index
    %2 = vector.load %arg1[%c0_3, %c0_4, %c1, %c0_5] : memref<1x17x17x4xf32, #tpu.memory_space<vmem>>, vector<1x16x16x4xf32>
    %3 = vector.shape_cast %2 : vector<1x16x16x4xf32> to vector<16x16x4xf32>
    %c0_6 = arith.constant 0 : index
    %c1_7 = arith.constant 1 : index
    %c0_8 = arith.constant 0 : index
    %c0_9 = arith.constant 0 : index
    %4 = vector.load %arg1[%c0_6, %c1_7, %c0_8, %c0_9] : memref<1x17x17x4xf32, #tpu.memory_space<vmem>>, vector<1x16x16x4xf32>
    %5 = vector.shape_cast %4 : vector<1x16x16x4xf32> to vector<16x16x4xf32>
    %c0_10 = arith.constant 0 : index
    %c1_11 = arith.constant 1 : index
    %c1_12 = arith.constant 1 : index
    %c0_13 = arith.constant 0 : index
    %6 = vector.load %arg1[%c0_10, %c1_11, %c1_12, %c0_13] : memref<1x17x17x4xf32, #tpu.memory_space<vmem>>, vector<1x16x16x4xf32>
    %7 = vector.shape_cast %6 : vector<1x16x16x4xf32> to vector<16x16x4xf32>
    %8 = tpu.concatenate %1, %3, %5, %7 in 2 : vector<16x16x4xf32>, vector<16x16x4xf32>, vector<16x16x4xf32>, vector<16x16x4xf32> -> vector<16x16x16xf32>
    %9 = vector.shape_cast %8 : vector<16x16x16xf32> to vector<256x16xf32>
    %c0_14 = arith.constant 0 : index
    %c0_15 = arith.constant 0 : index
    %10 = vector.load %arg2[%c0_14, %c0_15] : memref<16x32xf32, #tpu.memory_space<vmem>>, vector<16x32xf32>
    %cst = arith.constant dense<0.000000e+00> : vector<256x32xf32>
    %11 = tpu.matmul %9, %10, %cst {dimension_numbers = #tpu.dot_dimension_numbers<[1], [0], [0], [1], [0, 0, 1, 1], [], []>} : vector<256x16xf32>, vector<16x32xf32>, vector<256x32xf32> -> vector<256x32xf32>
    %cst_16 = arith.constant 0.000000e+00 : f32
    %12 = vector.broadcast %cst_16 : f32 to vector<256x32xf32>
    %13 = arith.maximumf %11, %12 : vector<256x32xf32>
    %cst_17 = arith.constant dense<0.000000e+00> : vector<32xf32>
    %14 = vector.multi_reduction <add>, %13, %cst_17 [0] : vector<256x32xf32> to vector<32xf32>
    %15 = vector.shape_cast %14 : vector<32xf32> to vector<1x32xf32>
    %16 = arith.mulf %13, %13 : vector<256x32xf32>
    %cst_18 = arith.constant dense<0.000000e+00> : vector<32xf32>
    %17 = vector.multi_reduction <add>, %16, %cst_18 [0] : vector<256x32xf32> to vector<32xf32>
    %18 = vector.shape_cast %17 : vector<32xf32> to vector<1x32xf32>
    %19 = vector.extract_strided_slice %15 {offsets = [0, 0], sizes = [1, 8], strides = [1, 1]} : vector<1x32xf32> to vector<1x8xf32>
    %20 = vector.extract_strided_slice %15 {offsets = [0, 8], sizes = [1, 8], strides = [1, 1]} : vector<1x32xf32> to vector<1x8xf32>
    %21 = arith.addf %19, %20 : vector<1x8xf32>
    %22 = vector.extract_strided_slice %15 {offsets = [0, 16], sizes = [1, 8], strides = [1, 1]} : vector<1x32xf32> to vector<1x8xf32>
    %23 = arith.addf %21, %22 : vector<1x8xf32>
    %24 = vector.extract_strided_slice %15 {offsets = [0, 24], sizes = [1, 8], strides = [1, 1]} : vector<1x32xf32> to vector<1x8xf32>
    %25 = arith.addf %23, %24 : vector<1x8xf32>
    %c0_19 = arith.constant 0 : index
    %c0_20 = arith.constant 0 : index
    %c0_21 = arith.constant 0 : index
    %26 = vector.load %arg3[%c0_19, %c0_20, %c0_21] : memref<1x1x8xf32, #tpu.memory_space<vmem>>, vector<1x1x8xf32>
    %27 = vector.shape_cast %26 : vector<1x1x8xf32> to vector<1x8xf32>
    %28 = vector.shape_cast %25 : vector<1x8xf32> to vector<1x1x8xf32>
    tpu.vector_store %arg3[%c0_19, %c0_20, %c0_21], %28 {strides = array<i32>} : memref<1x1x8xf32, #tpu.memory_space<vmem>>, vector<1x1x8xf32>,
    %29 = vector.extract_strided_slice %18 {offsets = [0, 0], sizes = [1, 8], strides = [1, 1]} : vector<1x32xf32> to vector<1x8xf32>
    %30 = vector.extract_strided_slice %18 {offsets = [0, 8], sizes = [1, 8], strides = [1, 1]} : vector<1x32xf32> to vector<1x8xf32>
    %31 = arith.addf %29, %30 : vector<1x8xf32>
    %32 = vector.extract_strided_slice %18 {offsets = [0, 16], sizes = [1, 8], strides = [1, 1]} : vector<1x32xf32> to vector<1x8xf32>
    %33 = arith.addf %31, %32 : vector<1x8xf32>
    %34 = vector.extract_strided_slice %18 {offsets = [0, 24], sizes = [1, 8], strides = [1, 1]} : vector<1x32xf32> to vector<1x8xf32>
    %35 = arith.addf %33, %34 : vector<1x8xf32>
    %c0_22 = arith.constant 0 : index
    %c0_23 = arith.constant 0 : index
    %c0_24 = arith.constant 0 : index
    %36 = vector.load %arg4[%c0_22, %c0_23, %c0_24] : memref<1x1x8xf32, #tpu.memory_space<vmem>>, vector<1x1x8xf32>
    %37 = vector.shape_cast %36 : vector<1x1x8xf32> to vector<1x8xf32>
    %38 = vector.shape_cast %35 : vector<1x8xf32> to vector<1x1x8xf32>
    tpu.vector_store %arg4[%c0_22, %c0_23, %c0_24], %38 {strides = array<i32>} : memref<1x1x8xf32, #tpu.memory_space<vmem>>, vector<1x1x8xf32>,
    return
  }
  func.func @transform_0(%arg0: i32) -> (i32, i32, i32, i32) {
    %c0_i32 = arith.constant 0 : i32
    %c0_i32_0 = arith.constant 0 : i32
    %c0_i32_1 = arith.constant 0 : i32
    %c0_i32_2 = arith.constant 0 : i32
    return %arg0, %c0_i32, %c0_i32_0, %c0_i32_1 : i32, i32, i32, i32
  }
  func.func @transform_1(%arg0: i32) -> (i32, i32) {
    %c0_i32 = arith.constant 0 : i32
    %c0_i32_0 = arith.constant 0 : i32
    %c0_i32_1 = arith.constant 0 : i32
    return %c0_i32, %c0_i32_0 : i32, i32
  }
  func.func @transform_2(%arg0: i32) -> (i32, i32, i32) {
    %c0_i32 = arith.constant 0 : i32
    %c0_i32_0 = arith.constant 0 : i32
    %c0_i32_1 = arith.constant 0 : i32
    return %arg0, %c0_i32, %c0_i32_0 : i32, i32, i32
  }
  func.func @transform_3(%arg0: i32) -> (i32, i32, i32) {
    %c0_i32 = arith.constant 0 : i32
    %c0_i32_0 = arith.constant 0 : i32
    %c0_i32_1 = arith.constant 0 : i32
    return %arg0, %c0_i32, %c0_i32_0 : i32, i32, i32
  }
}

module attributes {stable_mosaic.version = 11 : i64} {
  func.func @_conv_bn_kernel(%arg0: i32, %arg1: memref<1x17x17x4xf32, #tpu.memory_space<vmem>>, %arg2: memref<16x32xf32, #tpu.memory_space<vmem>>, %arg3: memref<1x32xf32, #tpu.memory_space<vmem>>, %arg4: memref<1x32xf32, #tpu.memory_space<vmem>>, %arg5: memref<1x256x32xf32, #tpu.memory_space<vmem>>) attributes {dimension_semantics = [#tpu.dimension_semantics<parallel>], iteration_bounds = array<i64: 2>, scalar_prefetch = 0 : i64, scratch_operands = 0 : i64, tpu.core_type = #tpu.core_type<tc>, window_params = [{transform_indices = @transform_0, window_bounds = array<i64: 1, 17, 17, 4>}, {pipeline_mode = #tpu.pipeline_mode<synchronous>, transform_indices = @transform_1, window_bounds = array<i64: 16, 32>}, {pipeline_mode = #tpu.pipeline_mode<synchronous>, transform_indices = @transform_2, window_bounds = array<i64: 1, 32>}, {pipeline_mode = #tpu.pipeline_mode<synchronous>, transform_indices = @transform_3, window_bounds = array<i64: 1, 32>}, {transform_indices = @transform_4, window_bounds = array<i64: 1, 256, 32>}]} {
    %c0 = arith.constant 0 : index
    %c0_0 = arith.constant 0 : index
    %c0_1 = arith.constant 0 : index
    %c0_2 = arith.constant 0 : index
    %0 = vector.load %arg1[%c0, %c0_0, %c0_1, %c0_2] : memref<1x17x17x4xf32, #tpu.memory_space<vmem>>, vector<1x16x16x4xf32>
    %1 = vector.shape_cast %0 : vector<1x16x16x4xf32> to vector<16x16x4xf32>
    %c0_3 = arith.constant 0 : index
    %c0_4 = arith.constant 0 : index
    %c1 = arith.constant 1 : index
    %c0_5 = arith.constant 0 : index
    %2 = vector.load %arg1[%c0_3, %c0_4, %c1, %c0_5] : memref<1x17x17x4xf32, #tpu.memory_space<vmem>>, vector<1x16x16x4xf32>
    %3 = vector.shape_cast %2 : vector<1x16x16x4xf32> to vector<16x16x4xf32>
    %c0_6 = arith.constant 0 : index
    %c1_7 = arith.constant 1 : index
    %c0_8 = arith.constant 0 : index
    %c0_9 = arith.constant 0 : index
    %4 = vector.load %arg1[%c0_6, %c1_7, %c0_8, %c0_9] : memref<1x17x17x4xf32, #tpu.memory_space<vmem>>, vector<1x16x16x4xf32>
    %5 = vector.shape_cast %4 : vector<1x16x16x4xf32> to vector<16x16x4xf32>
    %c0_10 = arith.constant 0 : index
    %c1_11 = arith.constant 1 : index
    %c1_12 = arith.constant 1 : index
    %c0_13 = arith.constant 0 : index
    %6 = vector.load %arg1[%c0_10, %c1_11, %c1_12, %c0_13] : memref<1x17x17x4xf32, #tpu.memory_space<vmem>>, vector<1x16x16x4xf32>
    %7 = vector.shape_cast %6 : vector<1x16x16x4xf32> to vector<16x16x4xf32>
    %8 = tpu.concatenate %1, %3, %5, %7 in 2 : vector<16x16x4xf32>, vector<16x16x4xf32>, vector<16x16x4xf32>, vector<16x16x4xf32> -> vector<16x16x16xf32>
    %9 = vector.shape_cast %8 : vector<16x16x16xf32> to vector<256x16xf32>
    %c0_14 = arith.constant 0 : index
    %c0_15 = arith.constant 0 : index
    %10 = vector.load %arg2[%c0_14, %c0_15] : memref<16x32xf32, #tpu.memory_space<vmem>>, vector<16x32xf32>
    %cst = arith.constant dense<0.000000e+00> : vector<256x32xf32>
    %11 = tpu.matmul %9, %10, %cst {dimension_numbers = #tpu.dot_dimension_numbers<[1], [0], [0], [1], [0, 0, 1, 1], [], []>} : vector<256x16xf32>, vector<16x32xf32>, vector<256x32xf32> -> vector<256x32xf32>
    %cst_16 = arith.constant 0.000000e+00 : f32
    %12 = vector.broadcast %cst_16 : f32 to vector<256x32xf32>
    %13 = arith.maximumf %11, %12 : vector<256x32xf32>
    %c0_17 = arith.constant 0 : index
    %c0_18 = arith.constant 0 : index
    %14 = vector.load %arg3[%c0_17, %c0_18] : memref<1x32xf32, #tpu.memory_space<vmem>>, vector<1x32xf32>
    %15 = vector.broadcast %14 : vector<1x32xf32> to vector<256x32xf32>
    %16 = arith.mulf %13, %15 : vector<256x32xf32>
    %c0_19 = arith.constant 0 : index
    %c0_20 = arith.constant 0 : index
    %17 = vector.load %arg4[%c0_19, %c0_20] : memref<1x32xf32, #tpu.memory_space<vmem>>, vector<1x32xf32>
    %18 = vector.broadcast %17 : vector<1x32xf32> to vector<256x32xf32>
    %19 = arith.addf %16, %18 : vector<256x32xf32>
    %c0_21 = arith.constant 0 : index
    %c0_22 = arith.constant 0 : index
    %c0_23 = arith.constant 0 : index
    %20 = vector.load %arg5[%c0_21, %c0_22, %c0_23] : memref<1x256x32xf32, #tpu.memory_space<vmem>>, vector<1x256x32xf32>
    %21 = vector.shape_cast %20 : vector<1x256x32xf32> to vector<256x32xf32>
    %22 = vector.shape_cast %19 : vector<256x32xf32> to vector<1x256x32xf32>
    tpu.vector_store %arg5[%c0_21, %c0_22, %c0_23], %22 {strides = array<i32>} : memref<1x256x32xf32, #tpu.memory_space<vmem>>, vector<1x256x32xf32>,
    return
  }
  func.func @transform_0(%arg0: i32) -> (i32, i32, i32, i32) {
    %c0_i32 = arith.constant 0 : i32
    %c0_i32_0 = arith.constant 0 : i32
    %c0_i32_1 = arith.constant 0 : i32
    %c0_i32_2 = arith.constant 0 : i32
    return %arg0, %c0_i32, %c0_i32_0, %c0_i32_1 : i32, i32, i32, i32
  }
  func.func @transform_1(%arg0: i32) -> (i32, i32) {
    %c0_i32 = arith.constant 0 : i32
    %c0_i32_0 = arith.constant 0 : i32
    %c0_i32_1 = arith.constant 0 : i32
    return %c0_i32, %c0_i32_0 : i32, i32
  }
  func.func @transform_2(%arg0: i32) -> (i32, i32) {
    %c0_i32 = arith.constant 0 : i32
    %c0_i32_0 = arith.constant 0 : i32
    %c0_i32_1 = arith.constant 0 : i32
    return %c0_i32, %c0_i32_0 : i32, i32
  }
  func.func @transform_3(%arg0: i32) -> (i32, i32) {
    %c0_i32 = arith.constant 0 : i32
    %c0_i32_0 = arith.constant 0 : i32
    %c0_i32_1 = arith.constant 0 : i32
    return %c0_i32, %c0_i32_0 : i32, i32
  }
  func.func @transform_4(%arg0: i32) -> (i32, i32, i32) {
    %c0_i32 = arith.constant 0 : i32
    %c0_i32_0 = arith.constant 0 : i32
    %c0_i32_1 = arith.constant 0 : i32
    return %arg0, %c0_i32, %c0_i32_0 : i32, i32, i32
  }
}

</mosaic_0001>

<bundles_post_ra>
// kernel: tile.18
= control target key start
LH: loop header
LB: loop body
LE: loop exit
PB: predicated region body
PF: predicated region fallthrough
CT: control target
= control target key end

     0   :  { %s22_s0 = inlined_call_operand.vmem [shape: f32[8], index: 0, kind: input, shape index: {}]   ;;  %s23_s1 = inlined_call_operand.vmem [shape: f32[4,8], index: 1, kind: output, shape index: {}]  }
   0x1   :  { %v4_v0 = vld [vmem:[%s22_s0] ss:$0 sm:$0xff] }
   0x2   :  { %5 = vst [vmem:[%s23_s1] sm:$0xf] %v4_v0 }

// kernel: tile.19
= control target key start
LH: loop header
LB: loop body
LE: loop exit
PB: predicated region body
PF: predicated region fallthrough
CT: control target
= control target key end

     0   :  { %vm8_vm0 = vcmask 64512   ;;  %s40_s8 = smov 8   ;;  %s41_s9 = smov 16   ;;  %vm14_vm1 = vcmask 261312   ;;  %vm20_vm2 = vcmask 195712   ;;  %vm26_vm3 = vcmask 130112   ;;  %s58_s0 = inlined_call_operand.vmem [shape: f32[4,8], index: 0, kind: input, shape index: {}]   ;;  %s59_s1 = inlined_call_operand.vmem [shape: f32[1,32], index: 1, kind: output, shape index: {}]  }
   0x1   :  { %v5_v0 = vld [vmem:[%s58_s0] sm:$0xf]  ;;  %s39_s0 = smov 24  }
   0x2   :  { %6 = vst [vmem:[#allocation1] sm:$0xf] %v5_v0 }
   0x9   :  { %v11_v1 = vld [vmem:[#allocation1 + $0x3] sm:$0x1]   ;;  %v23_v2 = vld [vmem:[#allocation1 + $0x1] sm:$0x1]   ;;  %v7_v3 = vld [vmem:[#allocation1] sm:$0x1]  }
   0xa   :  { %12 = vrot.lane.b32.xlu0 %v11_v1, %s39_s0  ;;  %24 = vrot.lane.b32.xlu1 %v23_v2, %s40_s8  ;;  %v17_v4 = vld [vmem:[#allocation1 + $0x2] sm:$0x1]   ;;  %9 = vst.msk [vmem:[#allocation0] sm:$0x1] %vm8_vm0, %v7_v3  }
   0xe   :  { %18 = vrot.lane.b32.xlu0 %v17_v4, %s41_s9 }
  0x7c   :  { %v13_v5 = vpop.permute.xlu0 %12   ;;  %v25_v6 = vpop.permute.xlu1 %24  }
  0x7d   :  { %15 = vst.msk [vmem:[#allocation0] sm:$0x1] %vm14_vm1, %v13_v5  }
  0x80   :  { %v19_v7 = vpop.permute.xlu0 %18  }
  0x81   :  { %21 = vst.msk [vmem:[#allocation0] sm:$0x1] %vm20_vm2, %v19_v7  }
  0x82   :  { %27 = vst.msk [vmem:[#allocation0] sm:$0x1] %vm26_vm3, %v25_v6  }
  0x89   :  { %v32_v8 = vld [vmem:[#allocation0] sm:$0x1] }
  0x8a   :  { %35 = vst [vmem:[%s59_s1] sm:$0x1] %v32_v8 }

// kernel: revS_forward.3
= control target key start
LH: loop header
LB: loop body
LE: loop exit
PB: predicated region body
PF: predicated region fallthrough
CT: control target
= control target key end

     0   :  { %s1579_s15 = smov 0   ;;  %s2168_s0 = inlined_call_operand.vmem [shape: f32[2,17,17,4], index: 0, kind: input, shape index: {}]   ;;  %s2169_s1 = inlined_call_operand.vmem [shape: f32[16,32], index: 1, kind: input, shape index: {}]   ;;  %s2170_s2 = inlined_call_operand.vmem [shape: f32[1,32], index: 2, kind: input, shape index: {}]   ;;  %s2171_s3 = inlined_call_operand.vmem [shape: f32[1,32], index: 3, kind: input, shape index: {}]   ;;  %s2172_s4 = inlined_call_operand.vmem [shape: f32[2,256,32], index: 4, kind: output, shape index: {}]  }
   0x1 LB: > { %s1332_s16 = sadd.s32 4294967295, %s1549_s15   ;;  %p1336_p0 = scmp.ge.s32.totalorder %s1549_s15, 1  ;;  %s1549_s15 = sphi %s1579_s15, %s14_s15  }
   0x2   : > { %p162_p1 = scmp.lt.s32.totalorder %s1549_s15, 3 }
   0x4   : > { %p163_p2 = pnand %p1336_p0, %p162_p1 }
   0x5   : > { %p188_p3 = scmp.lt.s32.totalorder (!%p163_p2), %s1332_s16, 1  ;;  %s1551_s21 = smov (!%p163_p2), 4  }
   0x6   : > { %166 = sbr.rel (%p163_p2) target bundleno = 522 (0x20a), region = 36  ;;  %s1552_s22 = smov (!%p163_p2), 8  }
   0x7   : > { %s1553_s23 = smov (!%p163_p2), 12  }
   0xb   : > { %s2174_s16 = smov (!%p188_p3, %s1332_s16), 1  ;;  %v811_v12 = vld [vmem:[%s2169_s1 + $0x8] sm:$0xff]  ;;  %v810_v13 = vld [vmem:[%s2169_s1] sm:$0xff]  ;;  %vm711_vm0 = vcmask 31744   ;;  %vm744_vm1 = vcmask 64512   ;;  %vm777_vm2 = vcmask 97280  }
   0xc   : > { %s1531_s17 = smul.u32 408, %s2174_s16  ;;  %1475 = vmatprep.subr.mxu0 %v811_v12  ;;  %1527 = vmatprep.subr.mxu1 %v811_v12  ;;  %vm812_vm3 = vcmask 130048   ;;  %s1440_s30 = sshll.u32 %s2174_s16, 8  ;;  %vm1244_vm4 = vcmask 261120  }
   0xd   : > { %1476 = vmatpush3.msra.mxu0 %v811_v12  ;;  %1529 = vmatpush3.msra.mxu1 %v811_v12  ;;  %s2037_s9 = scalar_lea.vmem %s2172_s4, %s1440_s30 }
   0xe   : > { %s1593_s20 = scalar_lea.vmem %s2168_s0, %s1531_s17  ;;  %1477 = vmatprep.subr.mxu0 %v810_v13  ;;  %1528 = vmatprep.subr.mxu1 %v810_v13 }
   0xf   : > { %v231_v0 = vld [vmem:[%s1593_s20 + $0x9] sm:$0xff]  ;;  %v230_v1 = vld [vmem:[%s1593_s20 + $0x1] sm:$0xff]  ;;  %v1610_v4 = vld [vmem:[%s1593_s20 + $0xd8] sm:$0xff]  ;;  %1478 = vmatpush3.msra.mxu0 %v810_v13  ;;  %1530 = vmatpush3.msra.mxu1 %v810_v13 }
  0x10   : > { %361 = vrot.lane.b32.xlu1 %v231_v0, %s1551_s21  ;;  %359 = vrot.lane.b32.xlu0 %v230_v1, %s1551_s21  ;;  %v1600_v2 = vld [vmem:[%s1593_s20 + $0xc9] sm:$0xff]  ;;  %v1603_v3 = vld [vmem:[%s1593_s20 + $0xc1] sm:$0xff] }
  0x11   : > { %v1613_v5 = vld [vmem:[%s1593_s20 + $0x18] sm:$0xff]  ;;  %v1620_v6 = vld [vmem:[%s1593_s20 + $0xe0] sm:$0xff]  ;;  %v1648_v14 = vld [vmem:[%s1593_s20 + $0xf0] sm:$0xff] }
  0x12   : > { %v1623_v7 = vld [vmem:[%s1593_s20 + $0x20] sm:$0xff]  ;;  %v1651_v15 = vld [vmem:[%s1593_s20 + $0x30] sm:$0xff]  ;;  %v1658_v16 = vld [vmem:[%s1593_s20 + $0xf8] sm:$0xff] }
  0x13   : > { %v1388_v8 = vld [vmem:[%s1593_s20 + $0xd9] sm:$0xff]  ;;  %v1389_v10 = vld [vmem:[%s1593_s20 + $0xe1] sm:$0xff]  ;;  %v1390_v18 = vld [vmem:[%s1593_s20 + $0xf1] sm:$0xff] }
  0x14   : > { %393 = vrot.lane.b32.xlu1 %v1600_v2, %s1551_s21  ;;  %391 = vrot.lane.b32.xlu0 %v1603_v3, %s1551_s21  ;;  %v1372_v9 = vld [vmem:[%s1593_s20 + $0x19] sm:$0xff]  ;;  %v1373_v11 = vld [vmem:[%s1593_s20 + $0x21] sm:$0xff] }
  0x15   : > { %v1661_v17 = vld [vmem:[%s1593_s20 + $0x38] sm:$0xff]  ;;  %v1680_v22 = vld [vmem:[%s1593_s20 + $0x108] sm:$0xff]  ;;  %v1690_v24 = vld [vmem:[%s1593_s20 + $0x110] sm:$0xff] }
  0x16   : > { %v1374_v19 = vld [vmem:[%s1593_s20 + $0x31] sm:$0xff]  ;;  %v1391_v20 = vld [vmem:[%s1593_s20 + $0xf9] sm:$0xff]  ;;  %v1683_v23 = vld [vmem:[%s1593_s20 + $0x48] sm:$0xff] }
  0x17   : > { %v1375_v21 = vld [vmem:[%s1593_s20 + $0x39] sm:$0xff]  ;;  %v1693_v25 = vld [vmem:[%s1593_s20 + $0x50] sm:$0xff]  ;;  %v1722_v32 = vld [vmem:[%s1593_s20 + $0x128] sm:$0xff] }
  0x18   : > { %519 = vrot.lane.b32.xlu1 %v1610_v4, %s1552_s22  ;;  %487 = vrot.lane.b32.xlu0 %v1613_v5, %s1552_s22  ;;  %v1392_v26 = vld [vmem:[%s1593_s20 + $0x109] sm:$0xff]  ;;  %v1393_v28 = vld [vmem:[%s1593_s20 + $0x111] sm:$0xff] }
  0x19   : > { %v1376_v27 = vld [vmem:[%s1593_s20 + $0x49] sm:$0xff]  ;;  %v1377_v29 = vld [vmem:[%s1593_s20 + $0x51] sm:$0xff]  ;;  %v1712_v30 = vld [vmem:[%s1593_s20 + $0x120] sm:$0xff] }
  0x1a   : > { %v1715_v31 = vld [vmem:[%s1593_s20 + $0x60] sm:$0xff]  ;;  %v1725_v33 = vld [vmem:[%s1593_s20 + $0x68] sm:$0xff]  ;;  %v1744_v38 = vld [vmem:[%s1593_s20 + $0x138] sm:$0xff] }
  0x1b   : > { %v1394_v34 = vld [vmem:[%s1593_s20 + $0x121] sm:$0xff]  ;;  %v1395_v36 = vld [vmem:[%s1593_s20 + $0x129] sm:$0xff]  ;;  %v1747_v39 = vld [vmem:[%s1593_s20 + $0x78] sm:$0xff] }
  0x1c   : > { %521 = vrot.lane.b32.xlu1 %v1620_v6, %s1552_s22  ;;  %489 = vrot.lane.b32.xlu0 %v1623_v7, %s1552_s22  ;;  %v1378_v35 = vld [vmem:[%s1593_s20 + $0x61] sm:$0xff]  ;;  %v1379_v37 = vld [vmem:[%s1593_s20 + $0x69] sm:$0xff] }
  0x1d   : > { %v1754_v40 = vld [vmem:[%s1593_s20 + $0x140] sm:$0xff]  ;;  %v1776_v52 = vld [vmem:[%s1593_s20 + $0x150] sm:$0xff]  ;;  %v1793_v60 = vld [vmem:[%s1593_s20 + $0x158] sm:$0xff] }
  0x1e   : > { %v1757_v41 = vld [vmem:[%s1593_s20 + $0x80] sm:$0xff]  ;;  %v1779_v53 = vld [vmem:[%s1593_s20 + $0x90] sm:$0xff]  ;;  %v1796_v61 = vld [vmem:[%s1593_s20 + $0x98] sm:$0xff] }
  0x1f   : > { %v1396_v42 = vld [vmem:[%s1593_s20 + $0x139] sm:$0xff]  ;;  %v1397_v44 = vld [vmem:[%s1593_s20 + $0x141] sm:$0xff] }
  0x20   : > { %647 = vrot.lane.b32.xlu1 %v1388_v8, %s1553_s23  ;;  %615 = vrot.lane.b32.xlu0 %v1372_v9, %s1553_s23  ;;  %v1380_v43 = vld [vmem:[%s1593_s20 + $0x79] sm:$0xff]  ;;  %v1381_v45 = vld [vmem:[%s1593_s20 + $0x81] sm:$0xff] }
  0x21   : > { %v198_v54 = vld [vmem:[%s1593_s20] sm:$0xff]  ;;  %v199_v62 = vld [vmem:[%s1593_s20 + $0x8] sm:$0xff] }
  0x22   : > { %v1783_v55 = vld [vmem:[%s1593_s20 + $0xc0] sm:$0xff]  ;;  %v1800_v63 = vld [vmem:[%s1593_s20 + $0xc8] sm:$0xff] }
  0x24   : > { %649 = vrot.lane.b32.xlu1 %v1389_v10, %s1553_s23  ;;  %617 = vrot.lane.b32.xlu0 %v1373_v11, %s1553_s23 }
  0x28   : > { %395 = vrot.lane.b32.xlu1 %v1388_v8, %s1551_s21  ;;  %363 = vrot.lane.b32.xlu0 %v1372_v9, %s1551_s21 }
  0x2c   : > { %397 = vrot.lane.b32.xlu1 %v1389_v10, %s1551_s21  ;;  %365 = vrot.lane.b32.xlu0 %v1373_v11, %s1551_s21 }
  0x30   : > { %523 = vrot.lane.b32.xlu1 %v1648_v14, %s1552_s22  ;;  %491 = vrot.lane.b32.xlu0 %v1651_v15, %s1552_s22 }
  0x34   : > { %525 = vrot.lane.b32.xlu1 %v1658_v16, %s1552_s22  ;;  %493 = vrot.lane.b32.xlu0 %v1661_v17, %s1552_s22 }
  0x38   : > { %651 = vrot.lane.b32.xlu1 %v1390_v18, %s1553_s23  ;;  %619 = vrot.lane.b32.xlu0 %v1374_v19, %s1553_s23 }
  0x3c   : > { %653 = vrot.lane.b32.xlu1 %v1391_v20, %s1553_s23  ;;  %621 = vrot.lane.b32.xlu0 %v1375_v21, %s1553_s23 }
  0x40   : > { %399 = vrot.lane.b32.xlu1 %v1390_v18, %s1551_s21  ;;  %367 = vrot.lane.b32.xlu0 %v1374_v19, %s1551_s21  ;;  %v1398_v18 = vld [vmem:[%s1593_s20 + $0x151] sm:$0xff] }
  0x41   : > { %v1382_v19 = vld [vmem:[%s1593_s20 + $0x91] sm:$0xff] }
  0x44   : > { %401 = vrot.lane.b32.xlu1 %v1391_v20, %s1551_s21  ;;  %369 = vrot.lane.b32.xlu0 %v1375_v21, %s1551_s21 }
  0x48   : > { %527 = vrot.lane.b32.xlu1 %v1680_v22, %s1552_s22  ;;  %495 = vrot.lane.b32.xlu0 %v1683_v23, %s1552_s22 }
  0x4c   : > { %529 = vrot.lane.b32.xlu1 %v1690_v24, %s1552_s22  ;;  %497 = vrot.lane.b32.xlu0 %v1693_v25, %s1552_s22 }
  0x50   : > { %655 = vrot.lane.b32.xlu1 %v1392_v26, %s1553_s23  ;;  %623 = vrot.lane.b32.xlu0 %v1376_v27, %s1553_s23 }
  0x54   : > { %657 = vrot.lane.b32.xlu1 %v1393_v28, %s1553_s23  ;;  %625 = vrot.lane.b32.xlu0 %v1377_v29, %s1553_s23 }
  0x58   : > { %403 = vrot.lane.b32.xlu1 %v1392_v26, %s1551_s21  ;;  %371 = vrot.lane.b32.xlu0 %v1376_v27, %s1551_s21 }
  0x5c   : > { %405 = vrot.lane.b32.xlu1 %v1393_v28, %s1551_s21  ;;  %373 = vrot.lane.b32.xlu0 %v1377_v29, %s1551_s21 }
  0x60   : > { %531 = vrot.lane.b32.xlu1 %v1712_v30, %s1552_s22  ;;  %499 = vrot.lane.b32.xlu0 %v1715_v31, %s1552_s22 }
  0x64   : > { %533 = vrot.lane.b32.xlu1 %v1722_v32, %s1552_s22  ;;  %501 = vrot.lane.b32.xlu0 %v1725_v33, %s1552_s22 }
  0x68   : > { %659 = vrot.lane.b32.xlu1 %v1394_v34, %s1553_s23  ;;  %627 = vrot.lane.b32.xlu0 %v1378_v35, %s1553_s23 }
  0x6c   : > { %661 = vrot.lane.b32.xlu1 %v1395_v36, %s1553_s23  ;;  %629 = vrot.lane.b32.xlu0 %v1379_v37, %s1553_s23 }
  0x70   : > { %407 = vrot.lane.b32.xlu1 %v1394_v34, %s1551_s21  ;;  %375 = vrot.lane.b32.xlu0 %v1378_v35, %s1551_s21  ;;  %v1399_v34 = vld [vmem:[%s1593_s20 + $0x159] sm:$0xff] }
  0x71   : > { %v1383_v35 = vld [vmem:[%s1593_s20 + $0x99] sm:$0xff] }
  0x74   : > { %409 = vrot.lane.b32.xlu1 %v1395_v36, %s1551_s21  ;;  %377 = vrot.lane.b32.xlu0 %v1379_v37, %s1551_s21 }
  0x78   : > { %535 = vrot.lane.b32.xlu1 %v1744_v38, %s1552_s22  ;;  %503 = vrot.lane.b32.xlu0 %v1747_v39, %s1552_s22 }
  0x7c   : > { %537 = vrot.lane.b32.xlu1 %v1754_v40, %s1552_s22  ;;  %505 = vrot.lane.b32.xlu0 %v1757_v41, %s1552_s22 }
  0x80   : > { %663 = vrot.lane.b32.xlu1 %v1396_v42, %s1553_s23  ;;  %631 = vrot.lane.b32.xlu0 %v1380_v43, %s1553_s23 }
  0x82   : > { %v362_v46 = vpop.permute.xlu1 %361  ;;  %v360_v47 = vpop.permute.xlu0 %359 }
  0x83   : > { %v712_v58 = vsel %vm711_vm0, %v198_v54, %v360_v47  ;;  %v713_v12 = vsel %vm711_vm0, %v199_v62, %v362_v46  ;;  %v1834_v46 = vld [vmem:[%s1593_s20 + $0x168] sm:$0xff]  ;;  %v1848_v54 = vld [vmem:[%s1593_s20 + $0x170] sm:$0xff] }
  0x84   : > { %665 = vrot.lane.b32.xlu1 %v1397_v44, %s1553_s23  ;;  %633 = vrot.lane.b32.xlu0 %v1381_v45, %s1553_s23  ;;  %v1837_v47 = vld [vmem:[%s1593_s20 + $0xa8] sm:$0xff] }
  0x86   : > { %v394_v48 = vpop.permute.xlu1 %393  ;;  %v392_v49 = vpop.permute.xlu0 %391 }
  0x87   : > { %v728_v59 = vsel %vm711_vm0, %v1783_v55, %v392_v49  ;;  %v729_v13 = vsel %vm711_vm0, %v1800_v63, %v394_v48 }
  0x88   : > { %411 = vrot.lane.b32.xlu1 %v1396_v42, %s1551_s21  ;;  %379 = vrot.lane.b32.xlu0 %v1380_v43, %s1551_s21 }
  0x8a   : > { %v520_v50 = vpop.permute.xlu1 %519  ;;  %v488_v51 = vpop.permute.xlu0 %487 }
  0x8b   : > { %v761_v0 = vsel %vm744_vm1, %v728_v59, %v520_v50  ;;  %v745_v1 = vsel %vm744_vm1, %v712_v58, %v488_v51 }
  0x8c   : > { %413 = vrot.lane.b32.xlu1 %v1397_v44, %s1551_s21  ;;  %381 = vrot.lane.b32.xlu0 %v1381_v45, %s1551_s21 }
  0x8e   : > { %v522_v56 = vpop.permute.xlu1 %521  ;;  %v490_v57 = vpop.permute.xlu0 %489 }
  0x8f   : > { %v762_v20 = vsel %vm744_vm1, %v729_v13, %v522_v56  ;;  %v746_v21 = vsel %vm744_vm1, %v713_v12, %v490_v57  ;;  %v1851_v56 = vld [vmem:[%s1593_s20 + $0xb0] sm:$0xff] }
  0x90   : > { %539 = vrot.lane.b32.xlu1 %v1776_v52, %s1552_s22  ;;  %507 = vrot.lane.b32.xlu0 %v1779_v53, %s1552_s22 }
  0x92   : > { %v648_v8 = vpop.permute.xlu1 %647  ;;  %v616_v9 = vpop.permute.xlu0 %615 }
  0x93   : > { %v778_v10 = vsel %vm777_vm2, %v745_v1, %v616_v9  ;;  %v794_v11 = vsel %vm777_vm2, %v761_v0, %v648_v8  ;;  %v1400_v8 = vld [vmem:[%s1593_s20 + $0x169] sm:$0xff] }
  0x94   : > { %541 = vrot.lane.b32.xlu1 %v1793_v60, %s1552_s22  ;;  %509 = vrot.lane.b32.xlu0 %v1796_v61, %s1552_s22  ;;  %v1384_v9 = vld [vmem:[%s1593_s20 + $0xa9] sm:$0xff] }
  0x95   : > { %1479 = vmatprep.mubr.msk.f32.mxu0 %vm812_vm3, %v778_v10  ;;  %1503 = vmatprep.mubr.msk.f32.mxu1 %vm812_vm3, %v794_v11 }
  0x96   : > { %v650_v26 = vpop.permute.xlu1 %649  ;;  %v618_v27 = vpop.permute.xlu0 %617 }
  0x97   : > { %v795_v28 = vsel %vm777_vm2, %v762_v20, %v650_v26  ;;  %v779_v29 = vsel %vm777_vm2, %v746_v21, %v618_v27 }
  0x98   : > { %667 = vrot.lane.b32.xlu1 %v1398_v18, %s1553_s23  ;;  %635 = vrot.lane.b32.xlu0 %v1382_v19, %s1553_s23 }
  0x99   : > { %1480 = vmatmul.mubr.msk.f32.vlgmr.msra.gmra.mxu0 %vm812_vm3, %v779_v29  ;;  %1504 = vmatmul.mubr.msk.f32.vlgmr.msra.gmra.mxu1 %vm812_vm3, %v795_v28 }
  0x9a   : > { %v396_v36 = vpop.permute.xlu1 %395  ;;  %v364_v37 = vpop.permute.xlu0 %363 }
  0x9b   : > { %v730_v50 = vsel %vm711_vm0, %v1610_v4, %v396_v36  ;;  %v714_v51 = vsel %vm711_vm0, %v1613_v5, %v364_v37 }
  0x9c   : > { %669 = vrot.lane.b32.xlu1 %v1399_v34, %s1553_s23  ;;  %637 = vrot.lane.b32.xlu0 %v1383_v35, %s1553_s23 }
  0x9e   : > { %v398_v42 = vpop.permute.xlu1 %397  ;;  %v366_v43 = vpop.permute.xlu0 %365 }
  0x9f   : > { %v731_v4 = vsel %vm711_vm0, %v1620_v6, %v398_v42  ;;  %v715_v5 = vsel %vm711_vm0, %v1623_v7, %v366_v43  ;;  %v1401_v7 = vld [vmem:[%s1593_s20 + $0x171] sm:$0xff]  ;;  %v1371_v43 = vld [vmem:[%s1593_s20 + $0x188] sm:$0xff] }
  0xa0   : > { %415 = vrot.lane.b32.xlu1 %v1398_v18, %s1551_s21  ;;  %383 = vrot.lane.b32.xlu0 %v1382_v19, %s1551_s21  ;;  %v1385_v19 = vld [vmem:[%s1593_s20 + $0xb1] sm:$0xff] }
  0xa2   : > { %v524_v44 = vpop.permute.xlu1 %523  ;;  %v492_v45 = vpop.permute.xlu0 %491 }
  0xa3   : > { %v763_v57 = vsel %vm744_vm1, %v730_v50, %v524_v44  ;;  %v747_v58 = vsel %vm744_vm1, %v714_v51, %v492_v45 }
  0xa4   : > { %417 = vrot.lane.b32.xlu1 %v1399_v34, %s1551_s21  ;;  %385 = vrot.lane.b32.xlu0 %v1383_v35, %s1551_s21  ;;  %v1370_v34 = vld [vmem:[%s1593_s20 + $0x180] sm:$0xff] }
  0xa6   : > { %v526_v48 = vpop.permute.xlu1 %525  ;;  %v494_v49 = vpop.permute.xlu0 %493 }
  0xa7   : > { %v764_v10 = vsel %vm744_vm1, %v731_v4, %v526_v48  ;;  %v748_v11 = vsel %vm744_vm1, %v715_v5, %v494_v49 }
  0xa8   : > { %543 = vrot.lane.b32.xlu1 %v1834_v46, %s1552_s22  ;;  %511 = vrot.lane.b32.xlu0 %v1837_v47, %s1552_s22 }
  0xaa   : > { %v652_v59 = vpop.permute.xlu1 %651  ;;  %v620_v62 = vpop.permute.xlu0 %619 }
  0xab   : > { %v796_v0 = vsel %vm777_vm2, %v763_v57, %v652_v59  ;;  %v780_v1 = vsel %vm777_vm2, %v747_v58, %v620_v62 }
  0xac   : > { %545 = vrot.lane.b32.xlu1 %v1848_v54, %s1552_s22  ;;  %513 = vrot.lane.b32.xlu0 %v1851_v56, %s1552_s22 }
  0xad   : > { %1482 = vmatprep.mubr.msk.f32.mxu0 %vm812_vm3, %v780_v1  ;;  %1506 = vmatprep.mubr.msk.f32.mxu1 %vm812_vm3, %v796_v0 }
  0xae   : > { %v654_v12 = vpop.permute.xlu1 %653  ;;  %v622_v13 = vpop.permute.xlu0 %621 }
  0xaf   : > { %v797_v18 = vsel %vm777_vm2, %v764_v10, %v654_v12  ;;  %v781_v6 = vsel %vm777_vm2, %v748_v11, %v622_v13 }
  0xb0   : > { %671 = vrot.lane.b32.xlu1 %v1400_v8, %s1553_s23  ;;  %639 = vrot.lane.b32.xlu0 %v1384_v9, %s1553_s23 }
  0xb1   : > { %1483 = vmatmul.mubr.msk.f32.gmra.mxu0 %vm812_vm3, %v781_v6  ;;  %1507 = vmatmul.mubr.msk.f32.gmra.mxu1 %vm812_vm3, %v797_v18 }
  0xb2   : > { %v400_v20 = vpop.permute.xlu1 %399  ;;  %v368_v21 = vpop.permute.xlu0 %367 }
  0xb3   : > { %v732_v37 = vsel %vm711_vm0, %v1648_v14, %v400_v20  ;;  %v716_v42 = vsel %vm711_vm0, %v1651_v15, %v368_v21 }
  0xb4   : > { %673 = vrot.lane.b32.xlu1 %v1401_v7, %s1553_s23  ;;  %641 = vrot.lane.b32.xlu0 %v1385_v19, %s1553_s23 }
  0xb6   : > { %v402_v26 = vpop.permute.xlu1 %401  ;;  %v370_v27 = vpop.permute.xlu0 %369 }
  0xb7   : > { %v733_v14 = vsel %vm711_vm0, %v1658_v16, %v402_v26  ;;  %v717_v15 = vsel %vm711_vm0, %v1661_v17, %v370_v27  ;;  %v1403_v16 = vld [vmem:[%s1593_s20 + $0x189] sm:$0xff] }
  0xb8   : > { %419 = vrot.lane.b32.xlu1 %v1400_v8, %s1551_s21  ;;  %387 = vrot.lane.b32.xlu0 %v1384_v9, %s1551_s21 }
  0xba   : > { %v528_v28 = vpop.permute.xlu1 %527  ;;  %v496_v29 = vpop.permute.xlu0 %495 }
  0xbb   : > { %v765_v44 = vsel %vm744_vm1, %v732_v37, %v528_v28  ;;  %v749_v45 = vsel %vm744_vm1, %v716_v42, %v496_v29 }
  0xbc   : > { %421 = vrot.lane.b32.xlu1 %v1401_v7, %s1551_s21  ;;  %389 = vrot.lane.b32.xlu0 %v1385_v19, %s1551_s21 }
  0xbe   : > { %v530_v35 = vpop.permute.xlu1 %529  ;;  %v498_v36 = vpop.permute.xlu0 %497 }
  0xbf   : > { %v766_v57 = vsel %vm744_vm1, %v733_v14, %v530_v35  ;;  %v750_v58 = vsel %vm744_vm1, %v717_v15, %v498_v36 }
  0xc0   : > { %547 = vrot.lane.b32.xlu1 %v1370_v34, %s1552_s22  ;;  %515 = vrot.lane.b32.xlu0 %v1783_v55, %s1552_s22  ;;  %v1402_v55 = vld [vmem:[%s1593_s20 + $0x181] sm:$0xff] }
  0xc2   : > { %v656_v48 = vpop.permute.xlu1 %655  ;;  %v624_v49 = vpop.permute.xlu0 %623 }
  0xc3   : > { %v798_v50 = vsel %vm777_vm2, %v765_v44, %v656_v48  ;;  %v782_v51 = vsel %vm777_vm2, %v749_v45, %v624_v49 }
  0xc4   : > { %549 = vrot.lane.b32.xlu1 %v1371_v43, %s1552_s22  ;;  %517 = vrot.lane.b32.xlu0 %v1800_v63, %s1552_s22 }
  0xc5   : > { %1485 = vmatprep.mubr.msk.f32.mxu0 %vm812_vm3, %v782_v51  ;;  %1509 = vmatprep.mubr.msk.f32.mxu1 %vm812_vm3, %v798_v50 }
  0xc6   : > { %v658_v59 = vpop.permute.xlu1 %657  ;;  %v626_v62 = vpop.permute.xlu0 %625 }
  0xc7   : > { %v799_v63 = vsel %vm777_vm2, %v766_v57, %v658_v59  ;;  %v783_v0 = vsel %vm777_vm2, %v750_v58, %v626_v62 }
  0xc8   : > { %675 = vrot.lane.b32.xlu1 %v1402_v55, %s1553_s23  ;;  %643 = vrot.lane.b32.xlu0 %v1603_v3, %s1553_s23 }
  0xc9   : > { %1486 = vmatmul.mubr.msk.f32.gmra.mxu0 %vm812_vm3, %v783_v0  ;;  %1510 = vmatmul.mubr.msk.f32.gmra.mxu1 %vm812_vm3, %v799_v63 }
  0xca   : > { %v404_v17 = vpop.permute.xlu1 %403  ;;  %v372_v1 = vpop.permute.xlu0 %371 }
  0xcb   : > { %v734_v3 = vsel %vm711_vm0, %v1680_v22, %v404_v17  ;;  %v718_v12 = vsel %vm711_vm0, %v1683_v23, %v372_v1 }
  0xcc   : > { %677 = vrot.lane.b32.xlu1 %v1403_v16, %s1553_s23  ;;  %645 = vrot.lane.b32.xlu0 %v1600_v2, %s1553_s23 }
  0xce   : > { %v406_v4 = vpop.permute.xlu1 %405  ;;  %v374_v5 = vpop.permute.xlu0 %373 }
  0xcf   : > { %v735_v22 = vsel %vm711_vm0, %v1690_v24, %v406_v4  ;;  %v719_v23 = vsel %vm711_vm0, %v1693_v25, %v374_v5 }
  0xd2   : > { %v532_v8 = vpop.permute.xlu1 %531  ;;  %v500_v9 = vpop.permute.xlu0 %499 }
  0xd3   : > { %v767_v13 = vsel %vm744_vm1, %v734_v3, %v532_v8  ;;  %v751_v18 = vsel %vm744_vm1, %v718_v12, %v500_v9 }
  0xd6   : > { %v534_v10 = vpop.permute.xlu1 %533  ;;  %v502_v11 = vpop.permute.xlu0 %501 }
  0xd7   : > { %v768_v20 = vsel %vm744_vm1, %v735_v22, %v534_v10  ;;  %v752_v21 = vsel %vm744_vm1, %v719_v23, %v502_v11 }
  0xda   : > { %v660_v6 = vpop.permute.xlu1 %659  ;;  %v628_v7 = vpop.permute.xlu0 %627 }
  0xdb   : > { %v800_v2 = vsel %vm777_vm2, %v767_v13, %v660_v6  ;;  %v784_v19 = vsel %vm777_vm2, %v751_v18, %v628_v7 }
  0xdc   : > { %1488 = vmatprep.mubr.msk.f32.mxu0 %vm812_vm3, %v784_v19  ;;  %1512 = vmatprep.mubr.msk.f32.mxu1 %vm812_vm3, %v800_v2 }
  0xde   : > { %v662_v26 = vpop.permute.xlu1 %661  ;;  %v630_v27 = vpop.permute.xlu0 %629 }
  0xdf   : > { %v801_v28 = vsel %vm777_vm2, %v768_v20, %v662_v26  ;;  %v785_v29 = vsel %vm777_vm2, %v752_v21, %v630_v27 }
  0xe0   : > { %1489 = vmatmul.mubr.msk.f32.gmra.mxu0 %vm812_vm3, %v785_v29  ;;  %1513 = vmatmul.mubr.msk.f32.gmra.mxu1 %vm812_vm3, %v801_v28 }
  0xe2   : > { %v408_v34 = vpop.permute.xlu1 %407  ;;  %v376_v35 = vpop.permute.xlu0 %375 }
  0xe3   : > { %v736_v44 = vsel %vm711_vm0, %v1712_v30, %v408_v34  ;;  %v720_v45 = vsel %vm711_vm0, %v1715_v31, %v376_v35 }
  0xe6   : > { %v410_v24 = vpop.permute.xlu1 %409  ;;  %v378_v36 = vpop.permute.xlu0 %377 }
  0xe7   : > { %v737_v30 = vsel %vm711_vm0, %v1722_v32, %v410_v24  ;;  %v721_v31 = vsel %vm711_vm0, %v1725_v33, %v378_v36 }
  0xea   : > { %v536_v37 = vpop.permute.xlu1 %535  ;;  %v504_v25 = vpop.permute.xlu0 %503 }
  0xeb   : > { %v769_v48 = vsel %vm744_vm1, %v736_v44, %v536_v37  ;;  %v753_v49 = vsel %vm744_vm1, %v720_v45, %v504_v25 }
  0xee   : > { %v538_v42 = vpop.permute.xlu1 %537  ;;  %v506_v43 = vpop.permute.xlu0 %505 }
  0xef   : > { %v770_v55 = vsel %vm744_vm1, %v737_v30, %v538_v42  ;;  %v754_v57 = vsel %vm744_vm1, %v721_v31, %v506_v43 }
  0xf2   : > { %v664_v50 = vpop.permute.xlu1 %663  ;;  %v632_v51 = vpop.permute.xlu0 %631 }
  0xf3   : > { %v802_v14 = vsel %vm777_vm2, %v769_v48, %v664_v50  ;;  %v786_v15 = vsel %vm777_vm2, %v753_v49, %v632_v51 }
  0xf4   : > { %1491 = vmatprep.mubr.msk.f32.mxu0 %vm812_vm3, %v786_v15  ;;  %1515 = vmatprep.mubr.msk.f32.mxu1 %vm812_vm3, %v802_v14 }
  0xf6   : > { %v666_v58 = vpop.permute.xlu1 %665  ;;  %v634_v59 = vpop.permute.xlu0 %633 }
  0xf7   : > { %v803_v62 = vsel %vm777_vm2, %v770_v55, %v666_v58  ;;  %v787_v63 = vsel %vm777_vm2, %v754_v57, %v634_v59 }
  0xf8   : > { %1492 = vmatmul.mubr.msk.f32.gmra.mxu0 %vm812_vm3, %v787_v63  ;;  %1516 = vmatmul.mubr.msk.f32.gmra.mxu1 %vm812_vm3, %v803_v62 }
  0xfa   : > { %v412_v0 = vpop.permute.xlu1 %411  ;;  %v380_v16 = vpop.permute.xlu0 %379 }
  0xfb   : > { %v738_v8 = vsel %vm711_vm0, %v1744_v38, %v412_v0  ;;  %v722_v9 = vsel %vm711_vm0, %v1747_v39, %v380_v16 }
  0xfe   : > { %v414_v32 = vpop.permute.xlu1 %413  ;;  %v382_v17 = vpop.permute.xlu0 %381 }
  0xff   : > { %v739_v38 = vsel %vm711_vm0, %v1754_v40, %v414_v32  ;;  %v723_v39 = vsel %vm711_vm0, %v1757_v41, %v382_v17 }
 0x102   : > { %v540_v1 = vpop.permute.xlu1 %539  ;;  %v508_v33 = vpop.permute.xlu0 %507 }
 0x103   : > { %v771_v10 = vsel %vm744_vm1, %v738_v8, %v540_v1  ;;  %v755_v11 = vsel %vm744_vm1, %v722_v9, %v508_v33 }
 0x106   : > { %v542_v4 = vpop.permute.xlu1 %541  ;;  %v510_v5 = vpop.permute.xlu0 %509 }
 0x107   : > { %v772_v6 = vsel %vm744_vm1, %v739_v38, %v542_v4  ;;  %v756_v7 = vsel %vm744_vm1, %v723_v39, %v510_v5 }
 0x10a   : > { %v668_v3 = vpop.permute.xlu1 %667  ;;  %v636_v12 = vpop.permute.xlu0 %635 }
 0x10b   : > { %v804_v13 = vsel %vm777_vm2, %v771_v10, %v668_v3  ;;  %v788_v18 = vsel %vm777_vm2, %v755_v11, %v636_v12  ;;  %v2030_v12 = vld [vmem:[%s2171_s3] ss:$0 sm:$0xff] }
 0x10c   : > { %1494 = vmatprep.mubr.msk.f32.mxu0 %vm812_vm3, %v788_v18  ;;  %1518 = vmatprep.mubr.msk.f32.mxu1 %vm812_vm3, %v804_v13 }
 0x10e   : > { %v670_v2 = vpop.permute.xlu1 %669  ;;  %v638_v19 = vpop.permute.xlu0 %637 }
 0x10f   : > { %v805_v22 = vsel %vm777_vm2, %v772_v6, %v670_v2  ;;  %v789_v23 = vsel %vm777_vm2, %v756_v7, %v638_v19 }
 0x110   : > { %1495 = vmatmul.mubr.msk.f32.gmra.mxu0 %vm812_vm3, %v789_v23  ;;  %1519 = vmatmul.mubr.msk.f32.gmra.mxu1 %vm812_vm3, %v805_v22 }
 0x112   : > { %v416_v20 = vpop.permute.xlu1 %415  ;;  %v384_v21 = vpop.permute.xlu0 %383 }
 0x113   : > { %v740_v34 = vsel %vm711_vm0, %v1776_v52, %v416_v20  ;;  %v724_v35 = vsel %vm711_vm0, %v1779_v53, %v384_v21 }
 0x116   : > { %v418_v40 = vpop.permute.xlu1 %417  ;;  %v386_v26 = vpop.permute.xlu0 %385 }
 0x117   : > { %v741_v52 = vsel %vm711_vm0, %v1793_v60, %v418_v40  ;;  %v725_v53 = vsel %vm711_vm0, %v1796_v61, %v386_v26 }
 0x11a   : > { %v544_v27 = vpop.permute.xlu1 %543  ;;  %v512_v41 = vpop.permute.xlu0 %511 }
 0x11b   : > { %v773_v24 = vsel %vm744_vm1, %v740_v34, %v544_v27  ;;  %v757_v36 = vsel %vm744_vm1, %v724_v35, %v512_v41 }
 0x11e   : > { %v546_v28 = vpop.permute.xlu1 %545  ;;  %v514_v29 = vpop.permute.xlu0 %513 }
 0x11f   : > { %v774_v44 = vsel %vm744_vm1, %v741_v52, %v546_v28  ;;  %v758_v45 = vsel %vm744_vm1, %v725_v53, %v514_v29 }
 0x122   : > { %v672_v37 = vpop.permute.xlu1 %671  ;;  %v640_v25 = vpop.permute.xlu0 %639 }
 0x123   : > { %v806_v42 = vsel %vm777_vm2, %v773_v24, %v672_v37  ;;  %v790_v43 = vsel %vm777_vm2, %v757_v36, %v640_v25 }
 0x124   : > { %1497 = vmatprep.mubr.msk.f32.mxu0 %vm812_vm3, %v790_v43  ;;  %1521 = vmatprep.mubr.msk.f32.mxu1 %vm812_vm3, %v806_v42 }
 0x126   : > { %v674_v48 = vpop.permute.xlu1 %673  ;;  %v642_v49 = vpop.permute.xlu0 %641 }
 0x127   : > { %v807_v50 = vsel %vm777_vm2, %v774_v44, %v674_v48  ;;  %v791_v51 = vsel %vm777_vm2, %v758_v45, %v642_v49 }
 0x128   : > { %1498 = vmatmul.mubr.msk.f32.gmra.mxu0 %vm812_vm3, %v791_v51  ;;  %1522 = vmatmul.mubr.msk.f32.gmra.mxu1 %vm812_vm3, %v807_v50 }
 0x12a   : > { %v420_v14 = vpop.permute.xlu1 %419  ;;  %v388_v15 = vpop.permute.xlu0 %387 }
 0x12b   : > { %v742_v58 = vsel %vm711_vm0, %v1834_v46, %v420_v14  ;;  %v726_v59 = vsel %vm711_vm0, %v1837_v47, %v388_v15 }
 0x12e   : > { %v422_v60 = vpop.permute.xlu1 %421  ;;  %v390_v30 = vpop.permute.xlu0 %389 }
 0x12f   : > { %v743_v46 = vsel %vm711_vm0, %v1848_v54, %v422_v60  ;;  %v727_v47 = vsel %vm711_vm0, %v1851_v56, %v390_v30  ;;  %v2024_v54 = vld [vmem:[%s2170_s2] ss:$0 sm:$0xff] }
 0x132   : > { %v548_v31 = vpop.permute.xlu1 %547  ;;  %v516_v61 = vpop.permute.xlu0 %515 }
 0x133   : > { %v775_v62 = vsel %vm744_vm1, %v742_v58, %v548_v31  ;;  %v759_v63 = vsel %vm744_vm1, %v726_v59, %v516_v61 }
 0x136   : > { %v550_v55 = vpop.permute.xlu1 %549  ;;  %v518_v57 = vpop.permute.xlu0 %517 }
 0x137   : > { %v776_v1 = vsel %vm744_vm1, %v743_v46, %v550_v55  ;;  %v760_v33 = vsel %vm744_vm1, %v727_v47, %v518_v57 }
 0x13a   : > { %v676_v0 = vpop.permute.xlu1 %675  ;;  %v644_v16 = vpop.permute.xlu0 %643 }
 0x13b   : > { %v808_v32 = vsel %vm777_vm2, %v775_v62, %v676_v0  ;;  %v792_v17 = vsel %vm777_vm2, %v759_v63, %v644_v16 }
 0x13c   : > { %1500 = vmatprep.mubr.msk.f32.mxu0 %vm812_vm3, %v792_v17  ;;  %1524 = vmatprep.mubr.msk.f32.mxu1 %vm812_vm3, %v808_v32 }
 0x13e   : > { %v678_v4 = vpop.permute.xlu1 %677  ;;  %v646_v5 = vpop.permute.xlu0 %645 }
 0x13f   : > { %v809_v8 = vsel %vm777_vm2, %v776_v1, %v678_v4  ;;  %v793_v9 = vsel %vm777_vm2, %v760_v33, %v646_v5 }
 0x140   : > { %1501 = vmatmul.mubr.msk.f32.gmra.mxu0 %vm812_vm3, %v793_v9  ;;  %1525 = vmatmul.mubr.msk.f32.gmra.mxu1 %vm812_vm3, %v809_v8 }
 0x159   : > { %v1481_v10 = vpop.f32.mrf.mxu0  ;;  %v1505_v56 = vpop.f32.mrf.mxu1 }
 0x15a   : > { %v1135_v11 = vmax.f32 %v1481_v10, 0.0  ;;  %v1151_v3 = vmax.f32 %v1505_v56, 0.0 }
 0x15b   : > { %v975_v13 = vpop.f32.mrf.mxu0  ;;  %v1055_v18 = vpop.f32.mrf.mxu1 }
 0x15c   : > { %v1174_v38 = vmul.f32 %v2024_v54, %v1135_v11  ;;  %v1190_v39 = vmul.f32 %v2024_v54, %v1151_v3  ;;  %v1134_v6 = vmax.f32 %v975_v13, 0.0  ;;  %v1150_v7 = vmax.f32 %v1055_v18, 0.0 }
 0x15e   : > { %v1213_v2 = vadd.f32 %v2030_v12, %v1174_v38  ;;  %v1229_v19 = vadd.f32 %v2030_v12, %v1190_v39  ;;  %v1173_v22 = vmul.f32 %v2024_v54, %v1134_v6  ;;  %v1189_v23 = vmul.f32 %v2024_v54, %v1150_v7 }
 0x160   : > { %1246 = vst.msk [vmem:[%s2037_s9 + $0x8] sm:$0xff] %vm1244_vm4, %v1213_v2  ;;  %1262 = vst.msk [vmem:[%s2037_s9 + $0x88] sm:$0xff] %vm1244_vm4, %v1229_v19  ;;  %v1212_v20 = vadd.f32 %v2030_v12, %v1173_v22  ;;  %v1228_v21 = vadd.f32 %v2030_v12, %v1189_v23 }
 0x162   : > { %1245 = vst.msk [vmem:[%s2037_s9] sm:$0xff] %vm1244_vm4, %v1212_v20  ;;  %1261 = vst.msk [vmem:[%s2037_s9 + $0x80] sm:$0xff] %vm1244_vm4, %v1228_v21 }
 0x171   : > { %v1484_v40 = vpop.f32.mrf.mxu0  ;;  %v1508_v26 = vpop.f32.mrf.mxu1 }
 0x172   : > { %v1137_v27 = vmax.f32 %v1484_v40, 0.0  ;;  %v1153_v41 = vmax.f32 %v1508_v26, 0.0 }
 0x173   : > { %v985_v28 = vpop.f32.mrf.mxu0  ;;  %v1065_v29 = vpop.f32.mrf.mxu1 }
 0x174   : > { %v1176_v34 = vmul.f32 %v2024_v54, %v1137_v27  ;;  %v1192_v35 = vmul.f32 %v2024_v54, %v1153_v41  ;;  %v1136_v24 = vmax.f32 %v985_v28, 0.0  ;;  %v1152_v36 = vmax.f32 %v1065_v29, 0.0 }
 0x176   : > { %v1215_v37 = vadd.f32 %v2030_v12, %v1176_v34  ;;  %v1231_v25 = vadd.f32 %v2030_v12, %v1192_v35  ;;  %v1175_v42 = vmul.f32 %v2024_v54, %v1136_v24  ;;  %v1191_v43 = vmul.f32 %v2024_v54, %v1152_v36 }
 0x178   : > { %1248 = vst.msk [vmem:[%s2037_s9 + $0x18] sm:$0xff] %vm1244_vm4, %v1215_v37  ;;  %1264 = vst.msk [vmem:[%s2037_s9 + $0x98] sm:$0xff] %vm1244_vm4, %v1231_v25  ;;  %v1214_v52 = vadd.f32 %v2030_v12, %v1175_v42  ;;  %v1230_v53 = vadd.f32 %v2030_v12, %v1191_v43 }
 0x17a   : > { %1247 = vst.msk [vmem:[%s2037_s9 + $0x10] sm:$0xff] %vm1244_vm4, %v1214_v52  ;;  %1263 = vst.msk [vmem:[%s2037_s9 + $0x90] sm:$0xff] %vm1244_vm4, %v1230_v53 }
 0x189   : > { %v1487_v44 = vpop.f32.mrf.mxu0  ;;  %v1511_v45 = vpop.f32.mrf.mxu1 }
 0x18a   : > { %v1139_v48 = vmax.f32 %v1487_v44, 0.0  ;;  %v1155_v49 = vmax.f32 %v1511_v45, 0.0 }
 0x18b   : > { %v995_v50 = vpop.f32.mrf.mxu0  ;;  %v1075_v51 = vpop.f32.mrf.mxu1 }
 0x18c   : > { %v1178_v14 = vmul.f32 %v2024_v54, %v1139_v48  ;;  %v1194_v15 = vmul.f32 %v2024_v54, %v1155_v49  ;;  %v1138_v60 = vmax.f32 %v995_v50, 0.0  ;;  %v1154_v30 = vmax.f32 %v1075_v51, 0.0 }
 0x18e   : > { %v1217_v31 = vadd.f32 %v2030_v12, %v1178_v14  ;;  %v1233_v61 = vadd.f32 %v2030_v12, %v1194_v15  ;;  %v1177_v55 = vmul.f32 %v2024_v54, %v1138_v60  ;;  %v1193_v57 = vmul.f32 %v2024_v54, %v1154_v30 }
 0x190   : > { %1250 = vst.msk [vmem:[%s2037_s9 + $0x28] sm:$0xff] %vm1244_vm4, %v1217_v31  ;;  %1266 = vst.msk [vmem:[%s2037_s9 + $0xa8] sm:$0xff] %vm1244_vm4, %v1233_v61  ;;  %v1216_v58 = vadd.f32 %v2030_v12, %v1177_v55  ;;  %v1232_v59 = vadd.f32 %v2030_v12, %v1193_v57 }
 0x192   : > { %1249 = vst.msk [vmem:[%s2037_s9 + $0x20] sm:$0xff] %vm1244_vm4, %v1216_v58  ;;  %1265 = vst.msk [vmem:[%s2037_s9 + $0xa0] sm:$0xff] %vm1244_vm4, %v1232_v59 }
 0x1a0   : > { %v1490_v62 = vpop.f32.mrf.mxu0  ;;  %v1514_v63 = vpop.f32.mrf.mxu1 }
 0x1a1   : > { %v1141_v0 = vmax.f32 %v1490_v62, 0.0  ;;  %v1157_v16 = vmax.f32 %v1514_v63, 0.0 }
 0x1a2   : > { %v1005_v32 = vpop.f32.mrf.mxu0  ;;  %v1085_v17 = vpop.f32.mrf.mxu1 }
 0x1a3   : > { %v1180_v46 = vmul.f32 %v2024_v54, %v1141_v0  ;;  %v1196_v47 = vmul.f32 %v2024_v54, %v1157_v16  ;;  %v1140_v1 = vmax.f32 %v1005_v32, 0.0  ;;  %v1156_v33 = vmax.f32 %v1085_v17, 0.0 }
 0x1a5   : > { %v1219_v4 = vadd.f32 %v2030_v12, %v1180_v46  ;;  %v1235_v5 = vadd.f32 %v2030_v12, %v1196_v47  ;;  %v1179_v8 = vmul.f32 %v2024_v54, %v1140_v1  ;;  %v1195_v9 = vmul.f32 %v2024_v54, %v1156_v33 }
 0x1a7   : > { %1252 = vst.msk [vmem:[%s2037_s9 + $0x38] sm:$0xff] %vm1244_vm4, %v1219_v4  ;;  %1268 = vst.msk [vmem:[%s2037_s9 + $0xb8] sm:$0xff] %vm1244_vm4, %v1235_v5  ;;  %v1218_v10 = vadd.f32 %v2030_v12, %v1179_v8  ;;  %v1234_v56 = vadd.f32 %v2030_v12, %v1195_v9 }
 0x1a9   : > { %1251 = vst.msk [vmem:[%s2037_s9 + $0x30] sm:$0xff] %vm1244_vm4, %v1218_v10  ;;  %1267 = vst.msk [vmem:[%s2037_s9 + $0xb0] sm:$0xff] %vm1244_vm4, %v1234_v56 }
 0x1b8   : > { %v1493_v11 = vpop.f32.mrf.mxu0  ;;  %v1517_v3 = vpop.f32.mrf.mxu1 }
 0x1b9   : > { %v1143_v13 = vmax.f32 %v1493_v11, 0.0  ;;  %v1159_v18 = vmax.f32 %v1517_v3, 0.0 }
 0x1ba   : > { %v1015_v38 = vpop.f32.mrf.mxu0  ;;  %v1095_v39 = vpop.f32.mrf.mxu1 }
 0x1bb   : > { %v1182_v6 = vmul.f32 %v2024_v54, %v1143_v13  ;;  %v1198_v7 = vmul.f32 %v2024_v54, %v1159_v18  ;;  %v1142_v2 = vmax.f32 %v1015_v38, 0.0  ;;  %v1158_v19 = vmax.f32 %v1095_v39, 0.0 }
 0x1bd   : > { %v1221_v22 = vadd.f32 %v2030_v12, %v1182_v6  ;;  %v1237_v23 = vadd.f32 %v2030_v12, %v1198_v7  ;;  %v1181_v20 = vmul.f32 %v2024_v54, %v1142_v2  ;;  %v1197_v21 = vmul.f32 %v2024_v54, %v1158_v19 }
 0x1bf   : > { %1254 = vst.msk [vmem:[%s2037_s9 + $0x48] sm:$0xff] %vm1244_vm4, %v1221_v22  ;;  %1270 = vst.msk [vmem:[%s2037_s9 + $0xc8] sm:$0xff] %vm1244_vm4, %v1237_v23  ;;  %v1220_v40 = vadd.f32 %v2030_v12, %v1181_v20  ;;  %v1236_v26 = vadd.f32 %v2030_v12, %v1197_v21 }
 0x1c1   : > { %1253 = vst.msk [vmem:[%s2037_s9 + $0x40] sm:$0xff] %vm1244_vm4, %v1220_v40  ;;  %1269 = vst.msk [vmem:[%s2037_s9 + $0xc0] sm:$0xff] %vm1244_vm4, %v1236_v26 }
 0x1d0   : > { %v1496_v27 = vpop.f32.mrf.mxu0  ;;  %v1520_v41 = vpop.f32.mrf.mxu1 }
 0x1d1   : > { %v1145_v28 = vmax.f32 %v1496_v27, 0.0  ;;  %v1161_v29 = vmax.f32 %v1520_v41, 0.0 }
 0x1d2   : > { %v1025_v34 = vpop.f32.mrf.mxu0  ;;  %v1105_v35 = vpop.f32.mrf.mxu1 }
 0x1d3   : > { %v1184_v24 = vmul.f32 %v2024_v54, %v1145_v28  ;;  %v1200_v36 = vmul.f32 %v2024_v54, %v1161_v29  ;;  %v1144_v37 = vmax.f32 %v1025_v34, 0.0  ;;  %v1160_v25 = vmax.f32 %v1105_v35, 0.0 }
 0x1d5   : > { %v1223_v42 = vadd.f32 %v2030_v12, %v1184_v24  ;;  %v1239_v43 = vadd.f32 %v2030_v12, %v1200_v36  ;;  %v1183_v52 = vmul.f32 %v2024_v54, %v1144_v37  ;;  %v1199_v53 = vmul.f32 %v2024_v54, %v1160_v25 }
 0x1d7   : > { %1256 = vst.msk [vmem:[%s2037_s9 + $0x58] sm:$0xff] %vm1244_vm4, %v1223_v42  ;;  %1272 = vst.msk [vmem:[%s2037_s9 + $0xd8] sm:$0xff] %vm1244_vm4, %v1239_v43  ;;  %v1222_v44 = vadd.f32 %v2030_v12, %v1183_v52  ;;  %v1238_v45 = vadd.f32 %v2030_v12, %v1199_v53 }
 0x1d9   : > { %1255 = vst.msk [vmem:[%s2037_s9 + $0x50] sm:$0xff] %vm1244_vm4, %v1222_v44  ;;  %1271 = vst.msk [vmem:[%s2037_s9 + $0xd0] sm:$0xff] %vm1244_vm4, %v1238_v45 }
 0x1e8   : > { %v1499_v48 = vpop.f32.mrf.mxu0  ;;  %v1523_v49 = vpop.f32.mrf.mxu1 }
 0x1e9   : > { %v1147_v50 = vmax.f32 %v1499_v48, 0.0  ;;  %v1163_v51 = vmax.f32 %v1523_v49, 0.0 }
 0x1ea   : > { %v1035_v14 = vpop.f32.mrf.mxu0  ;;  %v1115_v15 = vpop.f32.mrf.mxu1 }
 0x1eb   : > { %v1186_v60 = vmul.f32 %v2024_v54, %v1147_v50  ;;  %v1202_v30 = vmul.f32 %v2024_v54, %v1163_v51  ;;  %v1146_v31 = vmax.f32 %v1035_v14, 0.0  ;;  %v1162_v61 = vmax.f32 %v1115_v15, 0.0 }
 0x1ed   : > { %v1225_v55 = vadd.f32 %v2030_v12, %v1186_v60  ;;  %v1241_v57 = vadd.f32 %v2030_v12, %v1202_v30  ;;  %v1185_v58 = vmul.f32 %v2024_v54, %v1146_v31  ;;  %v1201_v59 = vmul.f32 %v2024_v54, %v1162_v61 }
 0x1ef   : > { %1258 = vst.msk [vmem:[%s2037_s9 + $0x68] sm:$0xff] %vm1244_vm4, %v1225_v55  ;;  %1274 = vst.msk [vmem:[%s2037_s9 + $0xe8] sm:$0xff] %vm1244_vm4, %v1241_v57  ;;  %v1224_v62 = vadd.f32 %v2030_v12, %v1185_v58  ;;  %v1240_v63 = vadd.f32 %v2030_v12, %v1201_v59 }
 0x1f1   : > { %1257 = vst.msk [vmem:[%s2037_s9 + $0x60] sm:$0xff] %vm1244_vm4, %v1224_v62  ;;  %1273 = vst.msk [vmem:[%s2037_s9 + $0xe0] sm:$0xff] %vm1244_vm4, %v1240_v63 }
 0x200   : > { %v1502_v0 = vpop.f32.mrf.mxu0  ;;  %v1526_v16 = vpop.f32.mrf.mxu1 }
 0x201   : > { %v1149_v32 = vmax.f32 %v1502_v0, 0.0  ;;  %v1165_v17 = vmax.f32 %v1526_v16, 0.0 }
 0x202   : > { %v1045_v46 = vpop.f32.mrf.mxu0  ;;  %v1125_v47 = vpop.f32.mrf.mxu1 }
 0x203   : > { %v1188_v1 = vmul.f32 %v2024_v54, %v1149_v32  ;;  %v1204_v33 = vmul.f32 %v2024_v54, %v1165_v17  ;;  %v1148_v4 = vmax.f32 %v1045_v46, 0.0  ;;  %v1164_v5 = vmax.f32 %v1125_v47, 0.0 }
 0x205   : > { %v1227_v8 = vadd.f32 %v2030_v12, %v1188_v1  ;;  %v1243_v9 = vadd.f32 %v2030_v12, %v1204_v33  ;;  %v1187_v10 = vmul.f32 %v2024_v54, %v1148_v4  ;;  %v1203_v56 = vmul.f32 %v2024_v54, %v1164_v5 }
 0x207   : > { %1260 = vst.msk [vmem:[%s2037_s9 + $0x78] sm:$0xff] %vm1244_vm4, %v1227_v8  ;;  %1276 = vst.msk [vmem:[%s2037_s9 + $0xf8] sm:$0xff] %vm1244_vm4, %v1243_v9  ;;  %v1226_v11 = vadd.f32 %v2030_v12, %v1187_v10  ;;  %v1242_v3 = vadd.f32 %v2030_v12, %v1203_v56 }
 0x209   : > { %1259 = vst.msk [vmem:[%s2037_s9 + $0x70] sm:$0xff] %vm1244_vm4, %v1226_v11  ;;  %1275 = vst.msk [vmem:[%s2037_s9 + $0xf0] sm:$0xff] %vm1244_vm4, %v1242_v3 }
 0x20a PF: > { %s14_s15 = sadd.s32 1, %s1549_s15  }
 0x20b   : > { %p11_p4 = scmp.ge.s32.totalorder %s14_s15, 4  }
 0x20d   :  { %13 = sbr.rel (!%p11_p4) target bundleno = 1 (0x1), region = 67 }

// kernel: revS_forward.2
= control target key start
LH: loop header
LB: loop body
LE: loop exit
PB: predicated region body
PF: predicated region fallthrough
CT: control target
= control target key end

     0   :  { %s1659_s12 = smov 0   ;;  %s2168_s0 = inlined_call_operand.vmem [shape: f32[2,17,17,4], index: 0, kind: input, shape index: {}]   ;;  %s2169_s1 = inlined_call_operand.vmem [shape: f32[16,32], index: 1, kind: input, shape index: {}]   ;;  %s2170_s2 = inlined_call_operand.vmem [shape: f32[2,1,8], index: 2, kind: output, shape index: {0}]   ;;  %s2171_s3 = inlined_call_operand.vmem [shape: f32[2,1,8], index: 3, kind: output, shape index: {1}]  }
   0x1 LB: > { %s1416_s13 = sadd.s32 4294967295, %s1631_s12   ;;  %p1420_p0 = scmp.ge.s32.totalorder %s1631_s12, 1  ;;  %s1631_s12 = sphi %s1659_s12, %s14_s12  }
   0x2   : > { %p140_p1 = scmp.lt.s32.totalorder %s1631_s12, 3 }
   0x4   : > { %p141_p2 = pnand %p1420_p0, %p140_p1 }
   0x5   : > { %p165_p3 = scmp.lt.s32.totalorder (!%p141_p2), %s1416_s13, 1  ;;  %s1633_s22 = smov (!%p141_p2), 8  }
   0x6   : > { %144 = sbr.rel (%p141_p2) target bundleno = 663 (0x297), region = 28  ;;  %s1634_s23 = smov (!%p141_p2), 4  }
   0x7   : > { %s1635_s24 = smov (!%p141_p2), 12   ;;  %s1636_s25 = smov (!%p141_p2), 120  }
   0x8   : > { %s1637_s26 = smov (!%p141_p2), 112   ;;  %s1638_s27 = smov (!%p141_p2), 104  }
   0xb   : > { %v789_v0 = vld [vmem:[%s2169_s1 + $0x8] sm:$0xff]  ;;  %s2173_s13 = smov (!%p165_p3, %s1416_s13), 1  ;;  %v788_v1 = vld [vmem:[%s2169_s1] sm:$0xff]  ;;  %vm689_vm0 = vcmask 31744   ;;  %vm722_vm1 = vcmask 64512   ;;  %vm755_vm2 = vcmask 97280  }
   0xc   : > { %1554 = vmatprep.subr.mxu0 %v789_v0  ;;  %1606 = vmatprep.subr.mxu1 %v789_v0  ;;  %s1610_s18 = smul.u32 408, %s2173_s13  ;;  %vm790_vm3 = vcmask 130048   ;;  %vm1144_vm4 = vcmask 261120   ;;  %s172_s30 = scalar_lea.vmem %s2170_s2, %s2173_s13  ;;  %vm1328_vm5 = vcmask 57344  }
   0xd   : > { %1555 = vmatpush3.msra.mxu0 %v789_v0  ;;  %1608 = vmatpush3.msra.mxu1 %v789_v0  ;;  %s175_s6 = scalar_lea.vmem %s2171_s3, %s2173_s13 }
   0xe   : > { %1556 = vmatprep.subr.mxu0 %v788_v1  ;;  %1607 = vmatprep.subr.mxu1 %v788_v1  ;;  %s1679_s21 = scalar_lea.vmem %s2168_s0, %s1610_s18 }
   0xf   : > { %1557 = vmatpush3.msra.mxu0 %v788_v1  ;;  %1609 = vmatpush3.msra.mxu1 %v788_v1  ;;  %v1682_v2 = vld [vmem:[%s1679_s21 + $0x18] sm:$0xff]  ;;  %v208_v3 = vld [vmem:[%s1679_s21 + $0x1] sm:$0xff]  ;;  %v209_v5 = vld [vmem:[%s1679_s21 + $0x9] sm:$0xff] }
  0x10   : > { %465 = vrot.lane.b32.xlu1 %v1682_v2, %s1633_s22  ;;  %337 = vrot.lane.b32.xlu0 %v208_v3, %s1634_s23  ;;  %v1689_v4 = vld [vmem:[%s1679_s21 + $0x20] sm:$0xff]  ;;  %v1702_v8 = vld [vmem:[%s1679_s21 + $0x38] sm:$0xff] }
  0x11   : > { %v1455_v6 = vld [vmem:[%s1679_s21 + $0x21] sm:$0xff]  ;;  %v1454_v7 = vld [vmem:[%s1679_s21 + $0x19] sm:$0xff]  ;;  %v1705_v9 = vld [vmem:[%s1679_s21 + $0x30] sm:$0xff] }
  0x12   : > { %v1457_v10 = vld [vmem:[%s1679_s21 + $0x39] sm:$0xff]  ;;  %v1456_v11 = vld [vmem:[%s1679_s21 + $0x31] sm:$0xff]  ;;  %v1721_v13 = vld [vmem:[%s1679_s21 + $0x48] sm:$0xff] }
  0x13   : > { %v1718_v12 = vld [vmem:[%s1679_s21 + $0x50] sm:$0xff]  ;;  %v1734_v16 = vld [vmem:[%s1679_s21 + $0x68] sm:$0xff]  ;;  %v1737_v17 = vld [vmem:[%s1679_s21 + $0x60] sm:$0xff] }
  0x14   : > { %467 = vrot.lane.b32.xlu1 %v1689_v4, %s1633_s22  ;;  %339 = vrot.lane.b32.xlu0 %v209_v5, %s1634_s23  ;;  %v1459_v14 = vld [vmem:[%s1679_s21 + $0x51] sm:$0xff]  ;;  %v1458_v15 = vld [vmem:[%s1679_s21 + $0x49] sm:$0xff] }
  0x15   : > { %v1461_v18 = vld [vmem:[%s1679_s21 + $0x69] sm:$0xff]  ;;  %v1460_v19 = vld [vmem:[%s1679_s21 + $0x61] sm:$0xff]  ;;  %v1753_v21 = vld [vmem:[%s1679_s21 + $0x78] sm:$0xff] }
  0x16   : > { %v1750_v20 = vld [vmem:[%s1679_s21 + $0x80] sm:$0xff]  ;;  %v1766_v24 = vld [vmem:[%s1679_s21 + $0x98] sm:$0xff]  ;;  %v1769_v25 = vld [vmem:[%s1679_s21 + $0x90] sm:$0xff] }
  0x17   : > { %v1463_v22 = vld [vmem:[%s1679_s21 + $0x81] sm:$0xff]  ;;  %v1462_v23 = vld [vmem:[%s1679_s21 + $0x79] sm:$0xff]  ;;  %v1464_v27 = vld [vmem:[%s1679_s21 + $0x91] sm:$0xff] }
  0x18   : > { %595 = vrot.lane.b32.xlu1 %v1455_v6, %s1635_s24  ;;  %593 = vrot.lane.b32.xlu0 %v1454_v7, %s1635_s24  ;;  %v1465_v26 = vld [vmem:[%s1679_s21 + $0x99] sm:$0xff]  ;;  %v1782_v28 = vld [vmem:[%s1679_s21 + $0xb0] sm:$0xff] }
  0x19   : > { %v1785_v29 = vld [vmem:[%s1679_s21 + $0xa8] sm:$0xff]  ;;  %v1467_v30 = vld [vmem:[%s1679_s21 + $0xb1] sm:$0xff]  ;;  %v1801_v33 = vld [vmem:[%s1679_s21 + $0xc0] sm:$0xff] }
  0x1a   : > { %v1466_v31 = vld [vmem:[%s1679_s21 + $0xa9] sm:$0xff]  ;;  %v1468_v35 = vld [vmem:[%s1679_s21 + $0xc1] sm:$0xff]  ;;  %v1817_v37 = vld [vmem:[%s1679_s21 + $0xd8] sm:$0xff] }
  0x1b   : > { %v1798_v32 = vld [vmem:[%s1679_s21 + $0xc8] sm:$0xff]  ;;  %v1814_v36 = vld [vmem:[%s1679_s21 + $0xe0] sm:$0xff]  ;;  %v1830_v40 = vld [vmem:[%s1679_s21 + $0xf8] sm:$0xff] }
  0x1c   : > { %343 = vrot.lane.b32.xlu1 %v1455_v6, %s1634_s23  ;;  %341 = vrot.lane.b32.xlu0 %v1454_v7, %s1634_s23  ;;  %v1469_v34 = vld [vmem:[%s1679_s21 + $0xc9] sm:$0xff]  ;;  %v1471_v38 = vld [vmem:[%s1679_s21 + $0xe1] sm:$0xff] }
  0x1d   : > { %v1470_v39 = vld [vmem:[%s1679_s21 + $0xd9] sm:$0xff]  ;;  %v1833_v41 = vld [vmem:[%s1679_s21 + $0xf0] sm:$0xff]  ;;  %v177_v47 = vld [vmem:[%s1679_s21 + $0x8] sm:$0xff] }
  0x1e   : > { %v1473_v42 = vld [vmem:[%s1679_s21 + $0xf9] sm:$0xff]  ;;  %v1472_v43 = vld [vmem:[%s1679_s21 + $0xf1] sm:$0xff]  ;;  %v1853_v53 = vld [vmem:[%s1679_s21 + $0x108] sm:$0xff] }
  0x1f   : > { %v176_v46 = vld [vmem:[%s1679_s21] sm:$0xff]  ;;  %v1850_v52 = vld [vmem:[%s1679_s21 + $0x110] sm:$0xff]  ;;  %v1876_v6 = vld [vmem:[%s1679_s21 + $0x128] sm:$0xff] }
  0x20   : > { %471 = vrot.lane.b32.xlu1 %v1702_v8, %s1633_s22  ;;  %469 = vrot.lane.b32.xlu0 %v1705_v9, %s1633_s22  ;;  %v1475_v60 = vld [vmem:[%s1679_s21 + $0x111] sm:$0xff]  ;;  %v1474_v61 = vld [vmem:[%s1679_s21 + $0x109] sm:$0xff] }
  0x21   : > { %v1879_v7 = vld [vmem:[%s1679_s21 + $0x120] sm:$0xff] }
  0x24   : > { %599 = vrot.lane.b32.xlu1 %v1457_v10, %s1635_s24  ;;  %597 = vrot.lane.b32.xlu0 %v1456_v11, %s1635_s24 }
  0x28   : > { %347 = vrot.lane.b32.xlu1 %v1457_v10, %s1634_s23  ;;  %345 = vrot.lane.b32.xlu0 %v1456_v11, %s1634_s23 }
  0x2c   : > { %475 = vrot.lane.b32.xlu1 %v1718_v12, %s1633_s22  ;;  %473 = vrot.lane.b32.xlu0 %v1721_v13, %s1633_s22 }
  0x30   : > { %603 = vrot.lane.b32.xlu1 %v1459_v14, %s1635_s24  ;;  %601 = vrot.lane.b32.xlu0 %v1458_v15, %s1635_s24 }
  0x34   : > { %351 = vrot.lane.b32.xlu1 %v1459_v14, %s1634_s23  ;;  %349 = vrot.lane.b32.xlu0 %v1458_v15, %s1634_s23 }
  0x38   : > { %479 = vrot.lane.b32.xlu1 %v1734_v16, %s1633_s22  ;;  %477 = vrot.lane.b32.xlu0 %v1737_v17, %s1633_s22 }
  0x3c   : > { %607 = vrot.lane.b32.xlu1 %v1461_v18, %s1635_s24  ;;  %605 = vrot.lane.b32.xlu0 %v1460_v19, %s1635_s24 }
  0x40   : > { %355 = vrot.lane.b32.xlu1 %v1461_v18, %s1634_s23  ;;  %353 = vrot.lane.b32.xlu0 %v1460_v19, %s1634_s23 }
  0x44   : > { %483 = vrot.lane.b32.xlu1 %v1750_v20, %s1633_s22  ;;  %481 = vrot.lane.b32.xlu0 %v1753_v21, %s1633_s22 }
  0x48   : > { %611 = vrot.lane.b32.xlu1 %v1463_v22, %s1635_s24  ;;  %609 = vrot.lane.b32.xlu0 %v1462_v23, %s1635_s24 }
  0x4c   : > { %359 = vrot.lane.b32.xlu1 %v1463_v22, %s1634_s23  ;;  %357 = vrot.lane.b32.xlu0 %v1462_v23, %s1634_s23 }
  0x50   : > { %487 = vrot.lane.b32.xlu1 %v1766_v24, %s1633_s22  ;;  %485 = vrot.lane.b32.xlu0 %v1769_v25, %s1633_s22 }
  0x54   : > { %615 = vrot.lane.b32.xlu1 %v1465_v26, %s1635_s24  ;;  %613 = vrot.lane.b32.xlu0 %v1464_v27, %s1635_s24 }
  0x58   : > { %363 = vrot.lane.b32.xlu1 %v1465_v26, %s1634_s23  ;;  %361 = vrot.lane.b32.xlu0 %v1464_v27, %s1634_s23 }
  0x5c   : > { %491 = vrot.lane.b32.xlu1 %v1782_v28, %s1633_s22  ;;  %489 = vrot.lane.b32.xlu0 %v1785_v29, %s1633_s22 }
  0x60   : > { %619 = vrot.lane.b32.xlu1 %v1467_v30, %s1635_s24  ;;  %617 = vrot.lane.b32.xlu0 %v1466_v31, %s1635_s24 }
  0x64   : > { %367 = vrot.lane.b32.xlu1 %v1467_v30, %s1634_s23  ;;  %365 = vrot.lane.b32.xlu0 %v1466_v31, %s1634_s23 }
  0x68   : > { %495 = vrot.lane.b32.xlu1 %v1798_v32, %s1633_s22  ;;  %493 = vrot.lane.b32.xlu0 %v1801_v33, %s1633_s22 }
  0x6c   : > { %623 = vrot.lane.b32.xlu1 %v1469_v34, %s1635_s24  ;;  %621 = vrot.lane.b32.xlu0 %v1468_v35, %s1635_s24 }
  0x70   : > { %371 = vrot.lane.b32.xlu1 %v1469_v34, %s1634_s23  ;;  %369 = vrot.lane.b32.xlu0 %v1468_v35, %s1634_s23  ;;  %v1902_v34 = vld [vmem:[%s1679_s21 + $0x140] sm:$0xff]  ;;  %v1905_v35 = vld [vmem:[%s1679_s21 + $0x138] sm:$0xff] }
  0x74   : > { %499 = vrot.lane.b32.xlu1 %v1814_v36, %s1633_s22  ;;  %497 = vrot.lane.b32.xlu0 %v1817_v37, %s1633_s22 }
  0x78   : > { %627 = vrot.lane.b32.xlu1 %v1471_v38, %s1635_s24  ;;  %625 = vrot.lane.b32.xlu0 %v1470_v39, %s1635_s24 }
  0x7c   : > { %375 = vrot.lane.b32.xlu1 %v1471_v38, %s1634_s23  ;;  %373 = vrot.lane.b32.xlu0 %v1470_v39, %s1634_s23 }
  0x80   : > { %503 = vrot.lane.b32.xlu1 %v1830_v40, %s1633_s22  ;;  %501 = vrot.lane.b32.xlu0 %v1833_v41, %s1633_s22 }
  0x82   : > { %v466_v44 = vpop.permute.xlu1 %465  ;;  %v338_v45 = vpop.permute.xlu0 %337 }
  0x83   : > { %v690_v50 = vsel %vm689_vm0, %v176_v46, %v338_v45 }
  0x84   : > { %631 = vrot.lane.b32.xlu1 %v1473_v42, %s1635_s24  ;;  %629 = vrot.lane.b32.xlu0 %v1472_v43, %s1635_s24  ;;  %v723_v57 = vsel %vm722_vm1, %v690_v50, %v466_v44 }
  0x86   : > { %v468_v48 = vpop.permute.xlu1 %467  ;;  %v340_v49 = vpop.permute.xlu0 %339 }
  0x87   : > { %v691_v51 = vsel %vm689_vm0, %v177_v47, %v340_v49 }
  0x88   : > { %379 = vrot.lane.b32.xlu1 %v1473_v42, %s1634_s23  ;;  %377 = vrot.lane.b32.xlu0 %v1472_v43, %s1634_s23  ;;  %v724_v55 = vsel %vm722_vm1, %v691_v51, %v468_v48 }
  0x8a   : > { %v596_v54 = vpop.permute.xlu1 %595  ;;  %v594_v56 = vpop.permute.xlu0 %593 }
  0x8b   : > { %v757_v58 = vsel %vm755_vm2, %v724_v55, %v596_v54  ;;  %v756_v59 = vsel %vm755_vm2, %v723_v57, %v594_v56  ;;  %v1928_v54 = vld [vmem:[%s1679_s21 + $0x158] sm:$0xff]  ;;  %v1931_v55 = vld [vmem:[%s1679_s21 + $0x150] sm:$0xff] }
  0x8c   : > { %507 = vrot.lane.b32.xlu1 %v1850_v52, %s1633_s22  ;;  %505 = vrot.lane.b32.xlu0 %v1853_v53, %s1633_s22 }
  0x8d   : > { %1558 = vmatprep.mubr.msk.f32.mxu0 %vm790_vm3, %v756_v59 }
  0x8e   : > { %1559 = vmatmul.mubr.msk.f32.vlgmr.msra.gmra.mxu0 %vm790_vm3, %v757_v58  ;;  %v344_v62 = vpop.permute.xlu1 %343  ;;  %v342_v63 = vpop.permute.xlu0 %341 }
  0x8f   : > { %v693_v3 = vsel %vm689_vm0, %v1689_v4, %v344_v62  ;;  %v692_v5 = vsel %vm689_vm0, %v1682_v2, %v342_v63  ;;  %v1477_v2 = vld [vmem:[%s1679_s21 + $0x129] sm:$0xff]  ;;  %v1476_v4 = vld [vmem:[%s1679_s21 + $0x121] sm:$0xff] }
  0x90   : > { %635 = vrot.lane.b32.xlu1 %v1475_v60, %s1635_s24  ;;  %633 = vrot.lane.b32.xlu0 %v1474_v61, %s1635_s24 }
  0x92   : > { %v472_v0 = vpop.permute.xlu1 %471  ;;  %v470_v1 = vpop.permute.xlu0 %469 }
  0x93   : > { %v726_v10 = vsel %vm722_vm1, %v693_v3, %v472_v0  ;;  %v725_v11 = vsel %vm722_vm1, %v692_v5, %v470_v1 }
  0x94   : > { %383 = vrot.lane.b32.xlu1 %v1475_v60, %s1634_s23  ;;  %381 = vrot.lane.b32.xlu0 %v1474_v61, %s1634_s23 }
  0x96   : > { %v600_v14 = vpop.permute.xlu1 %599  ;;  %v598_v15 = vpop.permute.xlu0 %597 }
  0x97   : > { %v759_v18 = vsel %vm755_vm2, %v726_v10, %v600_v14  ;;  %v758_v19 = vsel %vm755_vm2, %v725_v11, %v598_v15  ;;  %v1954_v10 = vld [vmem:[%s1679_s21 + $0x170] sm:$0xff]  ;;  %v1957_v11 = vld [vmem:[%s1679_s21 + $0x168] sm:$0xff] }
  0x98   : > { %511 = vrot.lane.b32.xlu1 %v1876_v6, %s1633_s22  ;;  %509 = vrot.lane.b32.xlu0 %v1879_v7, %s1633_s22 }
  0x99   : > { %1561 = vmatprep.mubr.msk.f32.mxu0 %vm790_vm3, %v758_v19 }
  0x9a   : > { %1562 = vmatmul.mubr.msk.f32.gmra.mxu0 %vm790_vm3, %v759_v18  ;;  %v348_v22 = vpop.permute.xlu1 %347  ;;  %v346_v23 = vpop.permute.xlu0 %345 }
  0x9b   : > { %v695_v30 = vsel %vm689_vm0, %v1702_v8, %v348_v22  ;;  %v694_v31 = vsel %vm689_vm0, %v1705_v9, %v346_v23  ;;  %v1479_v8 = vld [vmem:[%s1679_s21 + $0x141] sm:$0xff]  ;;  %v1478_v9 = vld [vmem:[%s1679_s21 + $0x139] sm:$0xff] }
  0x9c   : > { %639 = vrot.lane.b32.xlu1 %v1477_v2, %s1635_s24  ;;  %637 = vrot.lane.b32.xlu0 %v1476_v4, %s1635_s24 }
  0x9e   : > { %v476_v26 = vpop.permute.xlu1 %475  ;;  %v474_v27 = vpop.permute.xlu0 %473 }
  0x9f   : > { %v728_v38 = vsel %vm722_vm1, %v695_v30, %v476_v26  ;;  %v727_v39 = vsel %vm722_vm1, %v694_v31, %v474_v27 }
  0xa0   : > { %387 = vrot.lane.b32.xlu1 %v1477_v2, %s1634_s23  ;;  %385 = vrot.lane.b32.xlu0 %v1476_v4, %s1634_s23 }
  0xa2   : > { %v604_v42 = vpop.permute.xlu1 %603  ;;  %v602_v43 = vpop.permute.xlu0 %601 }
  0xa3   : > { %v761_v44 = vsel %vm755_vm2, %v728_v38, %v604_v42  ;;  %v760_v45 = vsel %vm755_vm2, %v727_v39, %v602_v43  ;;  %v1453_v38 = vld [vmem:[%s1679_s21 + $0x188] sm:$0xff]  ;;  %v1452_v39 = vld [vmem:[%s1679_s21 + $0x180] sm:$0xff] }
  0xa4   : > { %515 = vrot.lane.b32.xlu1 %v1902_v34, %s1633_s22  ;;  %513 = vrot.lane.b32.xlu0 %v1905_v35, %s1633_s22 }
  0xa5   : > { %1564 = vmatprep.mubr.msk.f32.mxu0 %vm790_vm3, %v760_v45 }
  0xa6   : > { %1565 = vmatmul.mubr.msk.f32.gmra.mxu0 %vm790_vm3, %v761_v44  ;;  %v352_v46 = vpop.permute.xlu1 %351  ;;  %v350_v47 = vpop.permute.xlu0 %349 }
  0xa7   : > { %v697_v50 = vsel %vm689_vm0, %v1718_v12, %v352_v46  ;;  %v696_v51 = vsel %vm689_vm0, %v1721_v13, %v350_v47  ;;  %v1481_v12 = vld [vmem:[%s1679_s21 + $0x159] sm:$0xff]  ;;  %v1480_v13 = vld [vmem:[%s1679_s21 + $0x151] sm:$0xff] }
  0xa8   : > { %643 = vrot.lane.b32.xlu1 %v1479_v8, %s1635_s24  ;;  %641 = vrot.lane.b32.xlu0 %v1478_v9, %s1635_s24 }
  0xaa   : > { %v480_v48 = vpop.permute.xlu1 %479  ;;  %v478_v49 = vpop.permute.xlu0 %477 }
  0xab   : > { %v730_v56 = vsel %vm722_vm1, %v697_v50, %v480_v48  ;;  %v729_v57 = vsel %vm722_vm1, %v696_v51, %v478_v49 }
  0xac   : > { %391 = vrot.lane.b32.xlu1 %v1479_v8, %s1634_s23  ;;  %389 = vrot.lane.b32.xlu0 %v1478_v9, %s1634_s23 }
  0xae   : > { %v608_v58 = vpop.permute.xlu1 %607  ;;  %v606_v59 = vpop.permute.xlu0 %605 }
  0xaf   : > { %v763_v60 = vsel %vm755_vm2, %v730_v56, %v608_v58  ;;  %v762_v61 = vsel %vm755_vm2, %v729_v57, %v606_v59 }
  0xb0   : > { %519 = vrot.lane.b32.xlu1 %v1928_v54, %s1633_s22  ;;  %517 = vrot.lane.b32.xlu0 %v1931_v55, %s1633_s22 }
  0xb1   : > { %1567 = vmatprep.mubr.msk.f32.mxu0 %vm790_vm3, %v762_v61 }
  0xb2   : > { %1568 = vmatmul.mubr.msk.f32.gmra.mxu0 %vm790_vm3, %v763_v60  ;;  %v356_v62 = vpop.permute.xlu1 %355  ;;  %v354_v63 = vpop.permute.xlu0 %353 }
  0xb3   : > { %v699_v3 = vsel %vm689_vm0, %v1734_v16, %v356_v62  ;;  %v698_v5 = vsel %vm689_vm0, %v1737_v17, %v354_v63  ;;  %v1483_v16 = vld [vmem:[%s1679_s21 + $0x171] sm:$0xff]  ;;  %v1482_v17 = vld [vmem:[%s1679_s21 + $0x169] sm:$0xff] }
  0xb4   : > { %647 = vrot.lane.b32.xlu1 %v1481_v12, %s1635_s24  ;;  %645 = vrot.lane.b32.xlu0 %v1480_v13, %s1635_s24 }
  0xb6   : > { %v484_v0 = vpop.permute.xlu1 %483  ;;  %v482_v1 = vpop.permute.xlu0 %481 }
  0xb7   : > { %v732_v14 = vsel %vm722_vm1, %v699_v3, %v484_v0  ;;  %v731_v15 = vsel %vm722_vm1, %v698_v5, %v482_v1 }
  0xb8   : > { %395 = vrot.lane.b32.xlu1 %v1481_v12, %s1634_s23  ;;  %393 = vrot.lane.b32.xlu0 %v1480_v13, %s1634_s23 }
  0xba   : > { %v612_v18 = vpop.permute.xlu1 %611  ;;  %v610_v19 = vpop.permute.xlu0 %609 }
  0xbb   : > { %v765_v2 = vsel %vm755_vm2, %v732_v14, %v612_v18  ;;  %v764_v4 = vsel %vm755_vm2, %v731_v15, %v610_v19 }
  0xbc   : > { %523 = vrot.lane.b32.xlu1 %v1954_v10, %s1633_s22  ;;  %521 = vrot.lane.b32.xlu0 %v1957_v11, %s1633_s22 }
  0xbd   : > { %1570 = vmatprep.mubr.msk.f32.mxu0 %vm790_vm3, %v764_v4 }
  0xbe   : > { %1571 = vmatmul.mubr.msk.f32.gmra.mxu0 %vm790_vm3, %v765_v2  ;;  %v360_v22 = vpop.permute.xlu1 %359  ;;  %v358_v23 = vpop.permute.xlu0 %357 }
  0xbf   : > { %v701_v30 = vsel %vm689_vm0, %v1750_v20, %v360_v22  ;;  %v700_v31 = vsel %vm689_vm0, %v1753_v21, %v358_v23  ;;  %v1485_v20 = vld [vmem:[%s1679_s21 + $0x189] sm:$0xff]  ;;  %v1484_v21 = vld [vmem:[%s1679_s21 + $0x181] sm:$0xff] }
  0xc0   : > { %651 = vrot.lane.b32.xlu1 %v1483_v16, %s1635_s24  ;;  %649 = vrot.lane.b32.xlu0 %v1482_v17, %s1635_s24 }
  0xc2   : > { %v488_v26 = vpop.permute.xlu1 %487  ;;  %v486_v27 = vpop.permute.xlu0 %485 }
  0xc3   : > { %v734_v42 = vsel %vm722_vm1, %v701_v30, %v488_v26  ;;  %v733_v43 = vsel %vm722_vm1, %v700_v31, %v486_v27 }
  0xc4   : > { %399 = vrot.lane.b32.xlu1 %v1483_v16, %s1634_s23  ;;  %397 = vrot.lane.b32.xlu0 %v1482_v17, %s1634_s23 }
  0xc6   : > { %v616_v44 = vpop.permute.xlu1 %615  ;;  %v614_v45 = vpop.permute.xlu0 %613 }
  0xc7   : > { %v767_v8 = vsel %vm755_vm2, %v734_v42, %v616_v44  ;;  %v766_v9 = vsel %vm755_vm2, %v733_v43, %v614_v45 }
  0xc8   : > { %527 = vrot.lane.b32.xlu1 %v1453_v38, %s1633_s22  ;;  %525 = vrot.lane.b32.xlu0 %v1452_v39, %s1633_s22 }
  0xc9   : > { %1573 = vmatprep.mubr.msk.f32.mxu0 %vm790_vm3, %v766_v9 }
  0xca   : > { %1574 = vmatmul.mubr.msk.f32.gmra.mxu0 %vm790_vm3, %v767_v8  ;;  %v364_v46 = vpop.permute.xlu1 %363  ;;  %v362_v47 = vpop.permute.xlu0 %361 }
  0xcb   : > { %v703_v50 = vsel %vm689_vm0, %v1766_v24, %v364_v46  ;;  %v702_v51 = vsel %vm689_vm0, %v1769_v25, %v362_v47 }
  0xcc   : > { %655 = vrot.lane.b32.xlu1 %v1485_v20, %s1635_s24  ;;  %653 = vrot.lane.b32.xlu0 %v1484_v21, %s1635_s24 }
  0xce   : > { %v492_v48 = vpop.permute.xlu1 %491  ;;  %v490_v49 = vpop.permute.xlu0 %489 }
  0xcf   : > { %v736_v56 = vsel %vm722_vm1, %v703_v50, %v492_v48  ;;  %v735_v57 = vsel %vm722_vm1, %v702_v51, %v490_v49 }
  0xd2   : > { %v620_v58 = vpop.permute.xlu1 %619  ;;  %v618_v59 = vpop.permute.xlu0 %617 }
  0xd3   : > { %v769_v60 = vsel %vm755_vm2, %v736_v56, %v620_v58  ;;  %v768_v61 = vsel %vm755_vm2, %v735_v57, %v618_v59 }
  0xd4   : > { %1576 = vmatprep.mubr.msk.f32.mxu0 %vm790_vm3, %v768_v61 }
  0xd5   : > { %1577 = vmatmul.mubr.msk.f32.gmra.mxu0 %vm790_vm3, %v769_v60 }
  0xd6   : > { %v368_v12 = vpop.permute.xlu1 %367  ;;  %v366_v13 = vpop.permute.xlu0 %365 }
  0xd7   : > { %v705_v25 = vsel %vm689_vm0, %v1782_v28, %v368_v12  ;;  %v704_v63 = vsel %vm689_vm0, %v1785_v29, %v366_v13 }
  0xda   : > { %v496_v24 = vpop.permute.xlu1 %495  ;;  %v494_v62 = vpop.permute.xlu0 %493 }
  0xdb   : > { %v738_v0 = vsel %vm722_vm1, %v705_v25, %v496_v24  ;;  %v737_v1 = vsel %vm722_vm1, %v704_v63, %v494_v62 }
  0xde   : > { %v624_v3 = vpop.permute.xlu1 %623  ;;  %v622_v5 = vpop.permute.xlu0 %621 }
  0xdf   : > { %v771_v14 = vsel %vm755_vm2, %v738_v0, %v624_v3  ;;  %v770_v15 = vsel %vm755_vm2, %v737_v1, %v622_v5 }
  0xe0   : > { %1579 = vmatprep.mubr.msk.f32.mxu0 %vm790_vm3, %v770_v15 }
  0xe1   : > { %1580 = vmatmul.mubr.msk.f32.gmra.mxu0 %vm790_vm3, %v771_v14 }
  0xe2   : > { %v372_v18 = vpop.permute.xlu1 %371  ;;  %v370_v19 = vpop.permute.xlu0 %369 }
  0xe3   : > { %v707_v29 = vsel %vm689_vm0, %v1798_v32, %v372_v18  ;;  %v706_v4 = vsel %vm689_vm0, %v1801_v33, %v370_v19 }
  0xe6   : > { %v500_v28 = vpop.permute.xlu1 %499  ;;  %v498_v2 = vpop.permute.xlu0 %497 }
  0xe7   : > { %v740_v16 = vsel %vm722_vm1, %v707_v29, %v500_v28  ;;  %v739_v17 = vsel %vm722_vm1, %v706_v4, %v498_v2 }
  0xea   : > { %v628_v22 = vpop.permute.xlu1 %627  ;;  %v626_v23 = vpop.permute.xlu0 %625 }
  0xeb   : > { %v773_v26 = vsel %vm755_vm2, %v740_v16, %v628_v22  ;;  %v772_v27 = vsel %vm755_vm2, %v739_v17, %v626_v23 }
  0xec   : > { %1582 = vmatprep.mubr.msk.f32.mxu1 %vm790_vm3, %v772_v27 }
  0xed   : > { %1583 = vmatmul.mubr.msk.f32.vlgmr.msra.gmra.mxu1 %vm790_vm3, %v773_v26 }
  0xee   : > { %v376_v30 = vpop.permute.xlu1 %375  ;;  %v374_v31 = vpop.permute.xlu0 %373 }
  0xef   : > { %v709_v33 = vsel %vm689_vm0, %v1814_v36, %v376_v30  ;;  %v708_v39 = vsel %vm689_vm0, %v1817_v37, %v374_v31 }
  0xf2   : > { %v504_v32 = vpop.permute.xlu1 %503  ;;  %v502_v38 = vpop.permute.xlu0 %501 }
  0xf3   : > { %v742_v42 = vsel %vm722_vm1, %v709_v33, %v504_v32  ;;  %v741_v43 = vsel %vm722_vm1, %v708_v39, %v502_v38 }
  0xf6   : > { %v632_v44 = vpop.permute.xlu1 %631  ;;  %v630_v45 = vpop.permute.xlu0 %629 }
  0xf7   : > { %v775_v8 = vsel %vm755_vm2, %v742_v42, %v632_v44  ;;  %v774_v9 = vsel %vm755_vm2, %v741_v43, %v630_v45 }
  0xf8   : > { %1585 = vmatprep.mubr.msk.f32.mxu1 %vm790_vm3, %v774_v9 }
  0xf9   : > { %1586 = vmatmul.mubr.msk.f32.gmra.mxu1 %vm790_vm3, %v775_v8 }
  0xfa   : > { %v380_v20 = vpop.permute.xlu1 %379  ;;  %v378_v21 = vpop.permute.xlu0 %377 }
  0xfb   : > { %v711_v37 = vsel %vm689_vm0, %v1830_v40, %v380_v20  ;;  %v710_v47 = vsel %vm689_vm0, %v1833_v41, %v378_v21 }
  0xfe   : > { %v508_v36 = vpop.permute.xlu1 %507  ;;  %v506_v46 = vpop.permute.xlu0 %505 }
  0xff   : > { %v744_v48 = vsel %vm722_vm1, %v711_v37, %v508_v36  ;;  %v743_v49 = vsel %vm722_vm1, %v710_v47, %v506_v46 }
 0x102   : > { %v636_v50 = vpop.permute.xlu1 %635  ;;  %v634_v51 = vpop.permute.xlu0 %633 }
 0x103   : > { %v777_v56 = vsel %vm755_vm2, %v744_v48, %v636_v50  ;;  %v776_v57 = vsel %vm755_vm2, %v743_v49, %v634_v51 }
 0x104   : > { %1588 = vmatprep.mubr.msk.f32.mxu1 %vm790_vm3, %v776_v57 }
 0x105   : > { %1589 = vmatmul.mubr.msk.f32.gmra.mxu1 %vm790_vm3, %v777_v56 }
 0x106   : > { %v384_v58 = vpop.permute.xlu1 %383  ;;  %v382_v59 = vpop.permute.xlu0 %381 }
 0x107   : > { %v713_v41 = vsel %vm689_vm0, %v1850_v52, %v384_v58  ;;  %v712_v61 = vsel %vm689_vm0, %v1853_v53, %v382_v59 }
 0x10a   : > { %v512_v40 = vpop.permute.xlu1 %511  ;;  %v510_v60 = vpop.permute.xlu0 %509 }
 0x10b   : > { %v746_v12 = vsel %vm722_vm1, %v713_v41, %v512_v40  ;;  %v745_v13 = vsel %vm722_vm1, %v712_v61, %v510_v60 }
 0x10e   : > { %v640_v24 = vpop.permute.xlu1 %639  ;;  %v638_v62 = vpop.permute.xlu0 %637 }
 0x10f   : > { %v779_v25 = vsel %vm755_vm2, %v746_v12, %v640_v24  ;;  %v778_v63 = vsel %vm755_vm2, %v745_v13, %v638_v62 }
 0x110   : > { %1591 = vmatprep.mubr.msk.f32.mxu1 %vm790_vm3, %v778_v63 }
 0x111   : > { %1592 = vmatmul.mubr.msk.f32.gmra.mxu1 %vm790_vm3, %v779_v25 }
 0x112   : > { %v388_v0 = vpop.permute.xlu1 %387  ;;  %v386_v1 = vpop.permute.xlu0 %385 }
 0x113   : > { %v715_v53 = vsel %vm689_vm0, %v1876_v6, %v388_v0  ;;  %v714_v5 = vsel %vm689_vm0, %v1879_v7, %v386_v1 }
 0x116   : > { %v516_v52 = vpop.permute.xlu1 %515  ;;  %v514_v3 = vpop.permute.xlu0 %513 }
 0x117   : > { %v748_v14 = vsel %vm722_vm1, %v715_v53, %v516_v52  ;;  %v747_v15 = vsel %vm722_vm1, %v714_v5, %v514_v3 }
 0x11a   : > { %v644_v18 = vpop.permute.xlu1 %643  ;;  %v642_v19 = vpop.permute.xlu0 %641 }
 0x11b   : > { %v781_v28 = vsel %vm755_vm2, %v748_v14, %v644_v18  ;;  %v780_v2 = vsel %vm755_vm2, %v747_v15, %v642_v19 }
 0x11c   : > { %1594 = vmatprep.mubr.msk.f32.mxu1 %vm790_vm3, %v780_v2 }
 0x11d   : > { %1595 = vmatmul.mubr.msk.f32.gmra.mxu1 %vm790_vm3, %v781_v28 }
 0x11e   : > { %v392_v29 = vpop.permute.xlu1 %391  ;;  %v390_v4 = vpop.permute.xlu0 %389 }
 0x11f   : > { %v717_v7 = vsel %vm689_vm0, %v1902_v34, %v392_v29  ;;  %v716_v17 = vsel %vm689_vm0, %v1905_v35, %v390_v4 }
 0x122   : > { %v520_v6 = vpop.permute.xlu1 %519  ;;  %v518_v16 = vpop.permute.xlu0 %517 }
 0x123   : > { %v750_v22 = vsel %vm722_vm1, %v717_v7, %v520_v6  ;;  %v749_v23 = vsel %vm722_vm1, %v716_v17, %v518_v16 }
 0x126   : > { %v648_v26 = vpop.permute.xlu1 %647  ;;  %v646_v27 = vpop.permute.xlu0 %645 }
 0x127   : > { %v783_v30 = vsel %vm755_vm2, %v750_v22, %v648_v26  ;;  %v782_v31 = vsel %vm755_vm2, %v749_v23, %v646_v27 }
 0x128   : > { %1597 = vmatprep.mubr.msk.f32.mxu1 %vm790_vm3, %v782_v31 }
 0x129   : > { %1598 = vmatmul.mubr.msk.f32.gmra.mxu1 %vm790_vm3, %v783_v30 }
 0x12a   : > { %v396_v32 = vpop.permute.xlu1 %395  ;;  %v394_v38 = vpop.permute.xlu0 %393 }
 0x12b   : > { %v719_v35 = vsel %vm689_vm0, %v1928_v54, %v396_v32  ;;  %v718_v39 = vsel %vm689_vm0, %v1931_v55, %v394_v38 }
 0x12e   : > { %v524_v34 = vpop.permute.xlu1 %523  ;;  %v522_v33 = vpop.permute.xlu0 %521 }
 0x12f   : > { %v752_v42 = vsel %vm722_vm1, %v719_v35, %v524_v34  ;;  %v751_v43 = vsel %vm722_vm1, %v718_v39, %v522_v33 }
 0x132   : > { %v652_v44 = vpop.permute.xlu1 %651  ;;  %v650_v45 = vpop.permute.xlu0 %649 }
 0x133   : > { %v785_v8 = vsel %vm755_vm2, %v752_v42, %v652_v44  ;;  %v784_v9 = vsel %vm755_vm2, %v751_v43, %v650_v45 }
 0x134   : > { %1600 = vmatprep.mubr.msk.f32.mxu1 %vm790_vm3, %v784_v9 }
 0x135   : > { %1601 = vmatmul.mubr.msk.f32.gmra.mxu1 %vm790_vm3, %v785_v8 }
 0x136   : > { %v400_v20 = vpop.permute.xlu1 %399  ;;  %v398_v21 = vpop.permute.xlu0 %397 }
 0x137   : > { %v721_v55 = vsel %vm689_vm0, %v1954_v10, %v400_v20  ;;  %v720_v46 = vsel %vm689_vm0, %v1957_v11, %v398_v21 }
 0x13a   : > { %v528_v54 = vpop.permute.xlu1 %527  ;;  %v526_v36 = vpop.permute.xlu0 %525 }
 0x13b   : > { %v754_v37 = vsel %vm722_vm1, %v721_v55, %v528_v54  ;;  %v753_v47 = vsel %vm722_vm1, %v720_v46, %v526_v36 }
 0x13e   : > { %v656_v48 = vpop.permute.xlu1 %655  ;;  %v654_v49 = vpop.permute.xlu0 %653 }
 0x13f   : > { %v787_v50 = vsel %vm755_vm2, %v754_v37, %v656_v48  ;;  %v786_v51 = vsel %vm755_vm2, %v753_v47, %v654_v49 }
 0x140   : > { %1603 = vmatprep.mubr.msk.f32.mxu1 %vm790_vm3, %v786_v51 }
 0x141   : > { %1604 = vmatmul.mubr.msk.f32.gmra.mxu1 %vm790_vm3, %v787_v50 }
 0x14e   : > { %v1560_v56 = vpop.f32.mrf.mxu0 }
 0x14f   : > { %v1113_v40 = vmax.f32 %v1560_v56, 0.0 }
 0x150   : > { %v953_v57 = vpop.f32.mrf.mxu0 }
 0x151   : > { %v1112_v59 = vmax.f32 %v953_v57, 0.0  ;;  %v1215_v12 = vmul.f32 %v1113_v40, %v1113_v40  ;;  %v1146_v62 = vsel %vm1144_vm4, %v1113_v40, 0.0 }
 0x153   : > { %v1214_v41 = vmul.f32 %v1112_v59, %v1112_v59  ;;  %v1145_v13 = vsel %vm1144_vm4, %v1112_v59, 0.0  ;;  %v1247_v53 = vsel %vm1144_vm4, %v1215_v12, 0.0 }
 0x154   : > { %v1147_v3 = vadd.f32 %v1146_v62, %v1145_v13 }
 0x155   : > { %v1246_v63 = vsel %vm1144_vm4, %v1214_v41, 0.0 }
 0x156   : > { %v1248_v14 = vadd.f32 %v1247_v53, %v1246_v63 }
 0x15a   : > { %v1563_v10 = vpop.f32.mrf.mxu0 }
 0x15b   : > { %v1115_v0 = vmax.f32 %v1563_v10, 0.0 }
 0x15c   : > { %v963_v58 = vpop.f32.mrf.mxu0 }
 0x15d   : > { %v1114_v60 = vmax.f32 %v963_v58, 0.0  ;;  %v1217_v19 = vmul.f32 %v1115_v0, %v1115_v0  ;;  %v1150_v4 = vsel %vm1144_vm4, %v1115_v0, 0.0 }
 0x15f   : > { %v1216_v24 = vmul.f32 %v1114_v60, %v1114_v60  ;;  %v1148_v1 = vsel %vm1144_vm4, %v1114_v60, 0.0  ;;  %v1251_v22 = vsel %vm1144_vm4, %v1217_v19, 0.0 }
 0x160   : > { %v1149_v15 = vadd.f32 %v1148_v1, %v1147_v3 }
 0x161   : > { %v1249_v5 = vsel %vm1144_vm4, %v1216_v24, 0.0 }
 0x162   : > { %v1250_v2 = vadd.f32 %v1249_v5, %v1248_v14  ;;  %v1151_v17 = vadd.f32 %v1150_v4, %v1149_v15 }
 0x164   : > { %v1252_v27 = vadd.f32 %v1251_v22, %v1250_v2 }
 0x166   : > { %v1566_v11 = vpop.f32.mrf.mxu0 }
 0x167   : > { %v1117_v6 = vmax.f32 %v1566_v11, 0.0 }
 0x168   : > { %v973_v61 = vpop.f32.mrf.mxu0 }
 0x169   : > { %v1116_v52 = vmax.f32 %v973_v61, 0.0  ;;  %v1219_v31 = vmul.f32 %v1117_v6, %v1117_v6  ;;  %v1154_v33 = vsel %vm1144_vm4, %v1117_v6, 0.0 }
 0x16b   : > { %v1218_v28 = vmul.f32 %v1116_v52, %v1116_v52  ;;  %v1152_v16 = vsel %vm1144_vm4, %v1116_v52, 0.0  ;;  %v1255_v44 = vsel %vm1144_vm4, %v1219_v31, 0.0 }
 0x16c   : > { %v1153_v26 = vadd.f32 %v1152_v16, %v1151_v17 }
 0x16d   : > { %v1253_v23 = vsel %vm1144_vm4, %v1218_v28, 0.0 }
 0x16e   : > { %v1254_v38 = vadd.f32 %v1253_v23, %v1252_v27  ;;  %v1155_v43 = vadd.f32 %v1154_v33, %v1153_v26 }
 0x170   : > { %v1256_v9 = vadd.f32 %v1255_v44, %v1254_v38 }
 0x172   : > { %v1569_v25 = vpop.f32.mrf.mxu0 }
 0x173   : > { %v1119_v35 = vmax.f32 %v1569_v25, 0.0 }
 0x174   : > { %v983_v18 = vpop.f32.mrf.mxu0 }
 0x175   : > { %v1118_v7 = vmax.f32 %v983_v18, 0.0  ;;  %v1221_v21 = vmul.f32 %v1119_v35, %v1119_v35  ;;  %v1158_v46 = vsel %vm1144_vm4, %v1119_v35, 0.0 }
 0x177   : > { %v1220_v32 = vmul.f32 %v1118_v7, %v1118_v7  ;;  %v1156_v39 = vsel %vm1144_vm4, %v1118_v7, 0.0  ;;  %v1259_v50 = vsel %vm1144_vm4, %v1221_v21, 0.0 }
 0x178   : > { %v1157_v8 = vadd.f32 %v1156_v39, %v1155_v43 }
 0x179   : > { %v1257_v45 = vsel %vm1144_vm4, %v1220_v32, 0.0 }
 0x17a   : > { %v1258_v36 = vadd.f32 %v1257_v45, %v1256_v9  ;;  %v1159_v49 = vadd.f32 %v1158_v46, %v1157_v8 }
 0x17c   : > { %v1260_v57 = vadd.f32 %v1259_v50, %v1258_v36 }
 0x17e   : > { %v1572_v29 = vpop.f32.mrf.mxu0 }
 0x17f   : > { %v1121_v37 = vmax.f32 %v1572_v29, 0.0 }
 0x180   : > { %v993_v30 = vpop.f32.mrf.mxu0 }
 0x181   : > { %v1120_v42 = vmax.f32 %v993_v30, 0.0  ;;  %v1223_v58 = vmul.f32 %v1121_v37, %v1121_v37  ;;  %v1162_v60 = vsel %vm1144_vm4, %v1121_v37, 0.0 }
 0x183   : > { %v1222_v54 = vmul.f32 %v1120_v42, %v1120_v42  ;;  %v1160_v47 = vsel %vm1144_vm4, %v1120_v42, 0.0  ;;  %v1263_v24 = vsel %vm1144_vm4, %v1223_v58, 0.0 }
 0x184   : > { %v1161_v56 = vadd.f32 %v1160_v47, %v1159_v49 }
 0x185   : > { %v1261_v51 = vsel %vm1144_vm4, %v1222_v54, 0.0 }
 0x186   : > { %v1262_v11 = vadd.f32 %v1261_v51, %v1260_v57  ;;  %v1163_v13 = vadd.f32 %v1162_v60, %v1161_v56 }
 0x188   : > { %v1264_v63 = vadd.f32 %v1263_v24, %v1262_v11 }
 0x18a   : > { %v1575_v34 = vpop.f32.mrf.mxu0 }
 0x18b   : > { %v1123_v41 = vmax.f32 %v1575_v34, 0.0 }
 0x18c   : > { %v1003_v20 = vpop.f32.mrf.mxu0 }
 0x18d   : > { %v1122_v48 = vmax.f32 %v1003_v20, 0.0  ;;  %v1225_v1 = vmul.f32 %v1123_v41, %v1123_v41  ;;  %v1166_v5 = vsel %vm1144_vm4, %v1123_v41, 0.0 }
 0x18f   : > { %v1224_v59 = vmul.f32 %v1122_v48, %v1122_v48  ;;  %v1164_v61 = vsel %vm1144_vm4, %v1122_v48, 0.0  ;;  %v1267_v28 = vsel %vm1144_vm4, %v1225_v1, 0.0 }
 0x190   : > { %v1165_v25 = vadd.f32 %v1164_v61, %v1163_v13 }
 0x191   : > { %v1265_v62 = vsel %vm1144_vm4, %v1224_v59, 0.0 }
 0x192   : > { %v1266_v3 = vadd.f32 %v1265_v62, %v1264_v63  ;;  %v1167_v19 = vadd.f32 %v1166_v5, %v1165_v25 }
 0x194   : > { %v1268_v4 = vadd.f32 %v1267_v28, %v1266_v3 }
 0x195   : > { %v1578_v55 = vpop.f32.mrf.mxu0 }
 0x196   : > { %v1125_v14 = vmax.f32 %v1578_v55, 0.0 }
 0x197   : > { %v1013_v10 = vpop.f32.mrf.mxu0 }
 0x198   : > { %v1124_v12 = vmax.f32 %v1013_v10, 0.0  ;;  %v1227_v16 = vmul.f32 %v1125_v14, %v1125_v14  ;;  %v1170_v23 = vsel %vm1144_vm4, %v1125_v14, 0.0 }
 0x19a   : > { %v1226_v52 = vmul.f32 %v1124_v12, %v1124_v12  ;;  %v1168_v15 = vsel %vm1144_vm4, %v1124_v12, 0.0  ;;  %v1271_v32 = vsel %vm1144_vm4, %v1227_v16, 0.0 }
 0x19b   : > { %v1169_v29 = vadd.f32 %v1168_v15, %v1167_v19 }
 0x19c   : > { %v1269_v2 = vsel %vm1144_vm4, %v1226_v52, 0.0 }
 0x19d   : > { %v1270_v17 = vadd.f32 %v1269_v2, %v1268_v4  ;;  %v1171_v31 = vadd.f32 %v1170_v23, %v1169_v29 }
 0x19f   : > { %v1272_v33 = vadd.f32 %v1271_v32, %v1270_v17 }
 0x1a1   : > { %v1581_v40 = vpop.f32.mrf.mxu0 }
 0x1a2   : > { %v1127_v26 = vmax.f32 %v1581_v40, 0.0 }
 0x1a3   : > { %v1023_v0 = vpop.f32.mrf.mxu0 }
 0x1a4   : > { %v1126_v18 = vmax.f32 %v1023_v0, 0.0  ;;  %v1229_v39 = vmul.f32 %v1127_v26, %v1127_v26  ;;  %v1174_v45 = vsel %vm1144_vm4, %v1127_v26, 0.0 }
 0x1a6   : > { %v1228_v7 = vmul.f32 %v1126_v18, %v1126_v18  ;;  %v1172_v27 = vsel %vm1144_vm4, %v1126_v18, 0.0  ;;  %v1275_v54 = vsel %vm1144_vm4, %v1229_v39, 0.0 }
 0x1a7   : > { %v1173_v34 = vadd.f32 %v1172_v27, %v1171_v31 }
 0x1a8   : > { %v1273_v38 = vsel %vm1144_vm4, %v1228_v7, 0.0 }
 0x1a9   : > { %v1274_v43 = vadd.f32 %v1273_v38, %v1272_v33  ;;  %v1175_v21 = vadd.f32 %v1174_v45, %v1173_v34 }
 0x1ab   : > { %v1276_v55 = vadd.f32 %v1275_v54, %v1274_v43 }
 0x1ad   : > { %v1584_v53 = vpop.f32.mrf.mxu1 }
 0x1ae   : > { %v1129_v8 = vmax.f32 %v1584_v53, 0.0 }
 0x1af   : > { %v1033_v6 = vpop.f32.mrf.mxu1 }
 0x1b0   : > { %v1128_v30 = vmax.f32 %v1033_v6, 0.0  ;;  %v1231_v47 = vmul.f32 %v1129_v8, %v1129_v8  ;;  %v1178_v51 = vsel %vm1144_vm4, %v1129_v8, 0.0 }
 0x1b2   : > { %v1230_v42 = vmul.f32 %v1128_v30, %v1128_v30  ;;  %v1176_v9 = vsel %vm1144_vm4, %v1128_v30, 0.0  ;;  %v1279_v59 = vsel %vm1144_vm4, %v1231_v47, 0.0 }
 0x1b3   : > { %v1177_v46 = vadd.f32 %v1176_v9, %v1175_v21 }
 0x1b4   : > { %v1277_v36 = vsel %vm1144_vm4, %v1230_v42, 0.0 }
 0x1b5   : > { %v1278_v49 = vadd.f32 %v1277_v36, %v1276_v55  ;;  %v1179_v58 = vadd.f32 %v1178_v51, %v1177_v46 }
 0x1b7   : > { %v1280_v60 = vadd.f32 %v1279_v59, %v1278_v49 }
 0x1b9   : > { %v1587_v22 = vpop.f32.mrf.mxu1 }
 0x1ba   : > { %v1131_v56 = vmax.f32 %v1587_v22, 0.0 }
 0x1bb   : > { %v1043_v35 = vpop.f32.mrf.mxu1 }
 0x1bc   : > { %v1130_v20 = vmax.f32 %v1043_v35, 0.0  ;;  %v1233_v61 = vmul.f32 %v1131_v56, %v1131_v56  ;;  %v1182_v62 = vsel %vm1144_vm4, %v1131_v56, 0.0 }
 0x1be   : > { %v1232_v48 = vmul.f32 %v1130_v20, %v1130_v20  ;;  %v1180_v57 = vsel %vm1144_vm4, %v1130_v20, 0.0  ;;  %v1283_v52 = vsel %vm1144_vm4, %v1233_v61, 0.0 }
 0x1bf   : > { %v1181_v40 = vadd.f32 %v1180_v57, %v1179_v58 }
 0x1c0   : > { %v1281_v11 = vsel %vm1144_vm4, %v1232_v48, 0.0 }
 0x1c1   : > { %v1282_v13 = vadd.f32 %v1281_v11, %v1280_v60  ;;  %v1183_v1 = vadd.f32 %v1182_v62, %v1181_v40 }
 0x1c3   : > { %v1284_v5 = vadd.f32 %v1283_v52, %v1282_v13 }
 0x1c5   : > { %v1590_v44 = vpop.f32.mrf.mxu1 }
 0x1c6   : > { %v1133_v25 = vmax.f32 %v1590_v44, 0.0 }
 0x1c7   : > { %v1053_v37 = vpop.f32.mrf.mxu1 }
 0x1c8   : > { %v1132_v10 = vmax.f32 %v1053_v37, 0.0  ;;  %v1235_v15 = vmul.f32 %v1133_v25, %v1133_v25  ;;  %v1186_v2 = vsel %vm1144_vm4, %v1133_v25, 0.0 }
 0x1ca   : > { %v1234_v12 = vmul.f32 %v1132_v10, %v1132_v10  ;;  %v1184_v63 = vsel %vm1144_vm4, %v1132_v10, 0.0  ;;  %v1287_v7 = vsel %vm1144_vm4, %v1235_v15, 0.0 }
 0x1cb   : > { %v1185_v53 = vadd.f32 %v1184_v63, %v1183_v1 }
 0x1cc   : > { %v1285_v3 = vsel %vm1144_vm4, %v1234_v12, 0.0 }
 0x1cd   : > { %v1286_v19 = vadd.f32 %v1285_v3, %v1284_v5  ;;  %v1187_v16 = vadd.f32 %v1186_v2, %v1185_v53 }
 0x1cf   : > { %v1288_v23 = vadd.f32 %v1287_v7, %v1286_v19 }
 0x1d1   : > { %v1593_v50 = vpop.f32.mrf.mxu1 }
 0x1d2   : > { %v1135_v29 = vmax.f32 %v1593_v50, 0.0 }
 0x1d3   : > { %v1063_v41 = vpop.f32.mrf.mxu1 }
 0x1d4   : > { %v1134_v0 = vmax.f32 %v1063_v41, 0.0  ;;  %v1237_v27 = vmul.f32 %v1135_v29, %v1135_v29  ;;  %v1190_v32 = vsel %vm1144_vm4, %v1135_v29, 0.0 }
 0x1d6   : > { %v1236_v18 = vmul.f32 %v1134_v0, %v1134_v0  ;;  %v1188_v4 = vsel %vm1144_vm4, %v1134_v0, 0.0  ;;  %v1291_v39 = vsel %vm1144_vm4, %v1237_v27, 0.0 }
 0x1d7   : > { %v1189_v22 = vadd.f32 %v1188_v4, %v1187_v16 }
 0x1d8   : > { %v1289_v17 = vsel %vm1144_vm4, %v1236_v18, 0.0 }
 0x1d9   : > { %v1290_v31 = vadd.f32 %v1289_v17, %v1288_v23  ;;  %v1191_v35 = vadd.f32 %v1190_v32, %v1189_v22 }
 0x1db   : > { %v1292_v44 = vadd.f32 %v1291_v39, %v1290_v31 }
 0x1dd   : > { %v1596_v24 = vpop.f32.mrf.mxu1 }
 0x1de   : > { %v1137_v38 = vmax.f32 %v1596_v24, 0.0 }
 0x1df   : > { %v1073_v14 = vpop.f32.mrf.mxu1 }
 0x1e0   : > { %v1136_v6 = vmax.f32 %v1073_v14, 0.0  ;;  %v1239_v8 = vmul.f32 %v1137_v38, %v1137_v38  ;;  %v1194_v54 = vsel %vm1144_vm4, %v1137_v38, 0.0 }
 0x1e2   : > { %v1238_v30 = vmul.f32 %v1136_v6, %v1136_v6  ;;  %v1192_v34 = vsel %vm1144_vm4, %v1136_v6, 0.0  ;;  %v1295_v47 = vsel %vm1144_vm4, %v1239_v8, 0.0 }
 0x1e3   : > { %v1193_v43 = vadd.f32 %v1192_v34, %v1191_v35 }
 0x1e4   : > { %v1293_v42 = vsel %vm1144_vm4, %v1238_v30, 0.0 }
 0x1e5   : > { %v1294_v20 = vadd.f32 %v1293_v42, %v1292_v44  ;;  %v1195_v37 = vadd.f32 %v1194_v54, %v1193_v43 }
 0x1e7   : > { %v1296_v50 = vadd.f32 %v1295_v47, %v1294_v20 }
 0x1e9   : > { %v1599_v28 = vpop.f32.mrf.mxu1 }
 0x1ea   : > { %v1139_v36 = vmax.f32 %v1599_v28, 0.0 }
 0x1eb   : > { %v1083_v26 = vpop.f32.mrf.mxu1 }
 0x1ec   : > { %v1138_v33 = vmax.f32 %v1083_v26, 0.0  ;;  %v1241_v51 = vmul.f32 %v1139_v36, %v1139_v36  ;;  %v1198_v10 = vsel %vm1144_vm4, %v1139_v36, 0.0 }
 0x1ee   : > { %v1240_v9 = vmul.f32 %v1138_v33, %v1138_v33  ;;  %v1196_v55 = vsel %vm1144_vm4, %v1138_v33, 0.0  ;;  %v1299_v40 = vsel %vm1144_vm4, %v1241_v51, 0.0 }
 0x1ef   : > { %v1197_v49 = vadd.f32 %v1196_v55, %v1195_v37 }
 0x1f0   : > { %v1297_v48 = vsel %vm1144_vm4, %v1240_v9, 0.0 }
 0x1f1   : > { %v1298_v57 = vadd.f32 %v1297_v48, %v1296_v50  ;;  %v1199_v11 = vadd.f32 %v1198_v10, %v1197_v49 }
 0x1f3   : > { %v1300_v61 = vadd.f32 %v1299_v40, %v1298_v57 }
 0x1f5   : > { %v1602_v45 = vpop.f32.mrf.mxu1 }
 0x1f6   : > { %v1141_v58 = vmax.f32 %v1602_v45, 0.0 }
 0x1f7   : > { %v1093_v21 = vpop.f32.mrf.mxu1 }
 0x1f8   : > { %v1140_v46 = vmax.f32 %v1093_v21, 0.0  ;;  %v1243_v13 = vmul.f32 %v1141_v58, %v1141_v58  ;;  %v1202_v63 = vsel %vm1144_vm4, %v1141_v58, 0.0 }
 0x1fa   : > { %v1242_v56 = vmul.f32 %v1140_v46, %v1140_v46  ;;  %v1200_v59 = vsel %vm1144_vm4, %v1140_v46, 0.0  ;;  %v1303_v52 = vsel %vm1144_vm4, %v1243_v13, 0.0 }
 0x1fb   : > { %v1201_v41 = vadd.f32 %v1200_v59, %v1199_v11 }
 0x1fc   : > { %v1301_v60 = vsel %vm1144_vm4, %v1242_v56, 0.0 }
 0x1fd   : > { %v1302_v62 = vadd.f32 %v1301_v60, %v1300_v61  ;;  %v1203_v1 = vadd.f32 %v1202_v63, %v1201_v41 }
 0x1ff   : > { %v1304_v15 = vadd.f32 %v1303_v52, %v1302_v62 }
 0x201   : > { %v1605_v12 = vpop.f32.mrf.mxu1 }
 0x202   : > { %v1143_v24 = vmax.f32 %v1605_v12, 0.0 }
 0x203   : > { %v1103_v25 = vpop.f32.mrf.mxu1 }
 0x204   : > { %v1142_v0 = vmax.f32 %v1103_v25, 0.0  ;;  %v1245_v3 = vmul.f32 %v1143_v24, %v1143_v24  ;;  %v1206_v18 = vsel %vm1144_vm4, %v1143_v24, 0.0 }
 0x206   : > { %v1204_v53 = vsel %vm1144_vm4, %v1142_v0, 0.0  ;;  %v1244_v5 = vmul.f32 %v1142_v0, %v1142_v0  ;;  %v1307_v29 = vsel %vm1144_vm4, %v1245_v3, 0.0 }
 0x207   : > { %v1205_v14 = vadd.f32 %v1204_v53, %v1203_v1 }
 0x208   : > { %v1305_v19 = vsel %vm1144_vm4, %v1244_v5, 0.0 }
 0x209   : > { %v1207_v28 = vadd.f32 %v1206_v18, %v1205_v14  ;;  %v1306_v2 = vadd.f32 %v1305_v19, %v1304_v15 }
 0x20b   : > { %v1208_v4 = vrot.slane %v1207_v28, 4  ;;  %v1308_v6 = vadd.f32 %v1307_v29, %v1306_v2 }
 0x20d   : > { %v1209_v16 = vadd.f32 %v1208_v4, %v1207_v28  ;;  %v1309_v7 = vrot.slane %v1308_v6, 4 }
 0x20f   : > { %v1210_v17 = vrot.slane %v1209_v16, 2  ;;  %v1310_v22 = vadd.f32 %v1309_v7, %v1308_v6 }
 0x211   : > { %v1211_v23 = vadd.f32 %v1210_v17, %v1209_v16  ;;  %v1311_v26 = vrot.slane %v1310_v22, 2 }
 0x213   : > { %v1212_v27 = vrot.slane %v1211_v23, 1  ;;  %v1312_v30 = vadd.f32 %v1311_v26, %v1310_v22 }
 0x215   : > { %v1213_v31 = vadd.f32 %v1212_v27, %v1211_v23  ;;  %v1313_v32 = vrot.slane %v1312_v30, 1 }
 0x217   : > { %1316 = vrot.lane.b32.xlu0 %v1213_v31, %s1636_s25  ;;  %v1314_v38 = vadd.f32 %v1313_v32, %v1312_v30 }
 0x219   : > { %1331 = vrot.lane.b32.xlu1 %v1314_v38, %s1636_s25 }
 0x21b   : > { %1320 = vrot.lane.b32.xlu0 %v1213_v31, %s1637_s26 }
 0x21d   : > { %1335 = vrot.lane.b32.xlu1 %v1314_v38, %s1637_s26 }
 0x21f   : > { %1324 = vrot.lane.b32.xlu0 %v1213_v31, %s1638_s27 }
 0x221   : > { %1339 = vrot.lane.b32.xlu1 %v1314_v38, %s1638_s27 }
 0x289   : > { %v1317_v34 = vpop.permute.xlu0 %1316 }
 0x28a   : > { %v1319_v39 = vadd.f32 %v1317_v34, %v1213_v31 }
 0x28b   : > { %v1332_v33 = vpop.permute.xlu1 %1331 }
 0x28c   : > { %v1334_v43 = vadd.f32 %v1332_v33, %v1314_v38 }
 0x28d   : > { %v1321_v35 = vpop.permute.xlu0 %1320 }
 0x28e   : > { %v1323_v44 = vadd.f32 %v1321_v35, %v1319_v39 }
 0x28f   : > { %v1336_v42 = vpop.permute.xlu1 %1335 }
 0x290   : > { %v1338_v8 = vadd.f32 %v1336_v42, %v1334_v43 }
 0x291   : > { %v1325_v45 = vpop.permute.xlu0 %1324 }
 0x292   : > { %v1327_v9 = vadd.f32 %v1325_v45, %v1323_v44 }
 0x293   : > { %v1340_v20 = vpop.permute.xlu1 %1339 }
 0x294   : > { %1329 = vst.msk [vmem:[%s172_s30] sm:$0x1] %vm1328_vm5, %v1327_v9  ;;  %v1342_v21 = vadd.f32 %v1340_v20, %v1338_v8 }
 0x296   : > { %1343 = vst.msk [vmem:[%s175_s6] sm:$0x1] %vm1328_vm5, %v1342_v21 }
 0x297 PF: > { %s14_s12 = sadd.s32 1, %s1631_s12  }
 0x298   : > { %p11_p4 = scmp.ge.s32.totalorder %s14_s12, 4  }
 0x29a   :  { %13 = sbr.rel (!%p11_p4) target bundleno = 1 (0x1), region = 71 }

</bundles_post_ra>
